<compile_context>
chip_gen: v6e
topology: v6e:2x2x1
jax: 0.10.0
libtpu: 0.0.40
codegen_flags: <defaults>
</compile_context>

<pallas_src>
import jax
import jax.numpy as jnp
from jax.experimental import pallas as pl
from jax.experimental.pallas import tpu as pltpu

N_SUB = 4  # fixed RK4 substeps per output time interval


def sir_ode_kernel(y0_ref, h_ref, half_h_ref, sixth_ref, params_ref, out_ref):
    beta = params_ref[0]
    gamma = params_ref[1]

    S = y0_ref[0]
    I = y0_ref[1]
    R0 = y0_ref[2]
    total = S + I + R0  # conserved; used to recover R at writeback

    # initial condition -> row 0
    out_ref[0, 0] = S
    out_ref[0, 1] = I
    out_ref[0, 2] = R0

    T = out_ref.shape[0]  # static

    def deriv(S, I):
        # Returns (bSI, dI); the sign of dS = -bSI is folded into the combine.
        # dI = beta*S*I - gamma*I factored as I*(beta*S - gamma): beta*S is
        # shared and one multiply per stage is saved.
        bS = beta * S
        bSI = bS * I
        dI = I * (bS - gamma)
        return bSI, dI

    # Fully static (unrolled) interval loop: T is a compile-time constant, so
    # all SMEM indices are static and there are no scf.for BB boundaries.
    for i in range(T - 1):
        h = h_ref[i]
        half_h = half_h_ref[i]
        sixth = sixth_ref[i]

        # Fully unrolled classical RK4 substeps.
        for _ in range(N_SUB):
            b1, d1 = deriv(S, I)
            b2, d2 = deriv(S - half_h * b1, I + half_h * d1)
            b3, d3 = deriv(S - half_h * b2, I + half_h * d2)
            b4, d4 = deriv(S - h * b3, I + h * d3)
            S = S - sixth * (b1 + 2.0 * (b2 + b3) + b4)
            I = I + sixth * (d1 + 2.0 * (d2 + d3) + d4)

        out_ref[i + 1, 0] = S
        out_ref[i + 1, 1] = I
        out_ref[i + 1, 2] = total - S - I  # R from conservation


def sir_odeint(params, y0, t):
    """Pallas equivalent of SIRODE(y0, t).forward(params) -> (T, 3) trajectory."""
    params = jnp.asarray(params, jnp.float32)
    y0 = jnp.asarray(y0, jnp.float32)
    t = jnp.asarray(t, jnp.float32)
    T = t.shape[0]
    # Precompute per-interval substep size and its derived constants on the
    # XLA side (free); the kernel then only does independent SMEM loads.
    h = jnp.diff(t) * jnp.float32(1.0 / N_SUB)        # (T-1,)
    half_h = jnp.float32(0.5) * h                     # (T-1,)
    sixth = h * jnp.float32(1.0 / 6.0)                # (T-1,)
    return pl.pallas_call(
        sir_ode_kernel,
        out_shape=jax.ShapeDtypeStruct((T, 3), jnp.float32),
        in_specs=[
            pl.BlockSpec(memory_space=pltpu.SMEM),  # y0
            pl.BlockSpec(memory_space=pltpu.SMEM),  # h
            pl.BlockSpec(memory_space=pltpu.SMEM),  # h/2
            pl.BlockSpec(memory_space=pltpu.SMEM),  # h/6
            pl.BlockSpec(memory_space=pltpu.SMEM),  # params (beta, gamma)
        ],
        out_specs=pl.BlockSpec(memory_space=pltpu.SMEM),
    )(y0, h, half_h, sixth, params)


if __name__ == "__main__":
    key = jax.random.PRNGKey(0)
    kb, kg = jax.random.split(key)

    # deterministic parameters (beta, gamma) and module "state" (y0, t)
    beta = jax.random.uniform(kb, (), jnp.float32, 0.2, 0.6)
    gamma = jax.random.uniform(kg, (), jnp.float32, 0.05, 0.2)
    params = jnp.stack([beta, gamma])                       # shape (2,)
    y0 = jnp.array([0.99, 0.01, 0.0], dtype=jnp.float32)    # [S0, I0, R0]
    t = jnp.linspace(0.0, 10.0, 8).astype(jnp.float32)      # 8 time points

    traj = jax.jit(sir_odeint)(params, y0, t)
    traj = jax.block_until_ready(traj)

    # sanity: shape, finiteness, conservation S + I + R == const.
    assert traj.shape == (8, 3)
    assert jnp.all(jnp.isfinite(traj))
    assert jnp.max(jnp.abs(traj.sum(axis=1) - traj[0].sum())) < 1e-4

    # High-accuracy reference (RK4 with 256 substeps per interval), NOT a
    # same-N_SUB twin, to validate the reduced N_SUB against the true solution.
    def ref_rk4(params, y0, t, n_sub):
        beta, gamma = params[0], params[1]

        def deriv(y):
            S, I, _ = y
            bSI = beta * S * I
            gI = gamma * I
            return jnp.stack([-bSI, bSI - gI, gI])

        def step_interval(y, dt):
            h = dt / n_sub

            def sub(_, y):
                k1 = deriv(y)
                k2 = deriv(y + 0.5 * h * k1)
                k3 = deriv(y + 0.5 * h * k2)
                k4 = deriv(y + h * k3)
                return y + (h / 6.0) * (k1 + 2.0 * k2 + 2.0 * k3 + k4)

            y = jax.lax.fori_loop(0, n_sub, sub, y)
            return y, y

        _, ys = jax.lax.scan(step_interval, y0, jnp.diff(t))
        return jnp.concatenate([y0[None], ys], axis=0)

    ref = ref_rk4(params, y0, t, 256)
    assert jnp.max(jnp.abs(traj - ref)) < 1e-4

    print("KERNEL_OK")
</pallas_src>

<mosaic_0001>
module attributes {stable_mosaic.version = 11 : i64} {
  func.func @sir_ode_kernel(%arg0: memref<3xf32, #tpu.memory_space<smem>>, %arg1: memref<7xf32, #tpu.memory_space<smem>>, %arg2: memref<7xf32, #tpu.memory_space<smem>>, %arg3: memref<7xf32, #tpu.memory_space<smem>>, %arg4: memref<2xf32, #tpu.memory_space<smem>>, %arg5: memref<8x3xf32, #tpu.memory_space<smem>>) attributes {dimension_semantics = [], scalar_prefetch = 0 : i64, scratch_operands = 0 : i64, tpu.core_type = #tpu.core_type<tc>} {
    %c0 = arith.constant 0 : index
    %0 = memref.load %arg4[%c0] : memref<2xf32, #tpu.memory_space<smem>>
    %c1 = arith.constant 1 : index
    %1 = memref.load %arg4[%c1] : memref<2xf32, #tpu.memory_space<smem>>
    %c0_0 = arith.constant 0 : index
    %2 = memref.load %arg0[%c0_0] : memref<3xf32, #tpu.memory_space<smem>>
    %c1_1 = arith.constant 1 : index
    %3 = memref.load %arg0[%c1_1] : memref<3xf32, #tpu.memory_space<smem>>
    %c2 = arith.constant 2 : index
    %4 = memref.load %arg0[%c2] : memref<3xf32, #tpu.memory_space<smem>>
    %5 = arith.addf %2, %3 : f32
    %6 = arith.addf %5, %4 : f32
    %c0_2 = arith.constant 0 : index
    %c0_3 = arith.constant 0 : index
    %7 = memref.load %arg5[%c0_2, %c0_3] : memref<8x3xf32, #tpu.memory_space<smem>>
    memref.store %2, %arg5[%c0_2, %c0_3] : memref<8x3xf32, #tpu.memory_space<smem>>
    %c0_4 = arith.constant 0 : index
    %c1_5 = arith.constant 1 : index
    %8 = memref.load %arg5[%c0_4, %c1_5] : memref<8x3xf32, #tpu.memory_space<smem>>
    memref.store %3, %arg5[%c0_4, %c1_5] : memref<8x3xf32, #tpu.memory_space<smem>>
    %c0_6 = arith.constant 0 : index
    %c2_7 = arith.constant 2 : index
    %9 = memref.load %arg5[%c0_6, %c2_7] : memref<8x3xf32, #tpu.memory_space<smem>>
    memref.store %4, %arg5[%c0_6, %c2_7] : memref<8x3xf32, #tpu.memory_space<smem>>
    %c0_8 = arith.constant 0 : index
    %10 = memref.load %arg1[%c0_8] : memref<7xf32, #tpu.memory_space<smem>>
    %c0_9 = arith.constant 0 : index
    %11 = memref.load %arg2[%c0_9] : memref<7xf32, #tpu.memory_space<smem>>
    %c0_10 = arith.constant 0 : index
    %12 = memref.load %arg3[%c0_10] : memref<7xf32, #tpu.memory_space<smem>>
    %13 = arith.mulf %0, %2 : f32
    %14 = arith.mulf %13, %3 : f32
    %15 = arith.subf %13, %1 : f32
    %16 = arith.mulf %3, %15 : f32
    %17 = arith.mulf %11, %14 : f32
    %18 = arith.subf %2, %17 : f32
    %19 = arith.mulf %11, %16 : f32
    %20 = arith.addf %3, %19 : f32
    %21 = arith.mulf %0, %18 : f32
    %22 = arith.mulf %21, %20 : f32
    %23 = arith.subf %21, %1 : f32
    %24 = arith.mulf %20, %23 : f32
    %25 = arith.mulf %11, %22 : f32
    %26 = arith.subf %2, %25 : f32
    %27 = arith.mulf %11, %24 : f32
    %28 = arith.addf %3, %27 : f32
    %29 = arith.mulf %0, %26 : f32
    %30 = arith.mulf %29, %28 : f32
    %31 = arith.subf %29, %1 : f32
    %32 = arith.mulf %28, %31 : f32
    %33 = arith.mulf %10, %30 : f32
    %34 = arith.subf %2, %33 : f32
    %35 = arith.mulf %10, %32 : f32
    %36 = arith.addf %3, %35 : f32
    %37 = arith.mulf %0, %34 : f32
    %38 = arith.mulf %37, %36 : f32
    %39 = arith.subf %37, %1 : f32
    %40 = arith.mulf %36, %39 : f32
    %41 = arith.addf %22, %30 : f32
    %cst = arith.constant 2.000000e+00 : f32
    %42 = arith.mulf %cst, %41 : f32
    %43 = arith.addf %14, %42 : f32
    %44 = arith.addf %43, %38 : f32
    %45 = arith.mulf %12, %44 : f32
    %46 = arith.subf %2, %45 : f32
    %47 = arith.addf %24, %32 : f32
    %cst_11 = arith.constant 2.000000e+00 : f32
    %48 = arith.mulf %cst_11, %47 : f32
    %49 = arith.addf %16, %48 : f32
    %50 = arith.addf %49, %40 : f32
    %51 = arith.mulf %12, %50 : f32
    %52 = arith.addf %3, %51 : f32
    %53 = arith.mulf %0, %46 : f32
    %54 = arith.mulf %53, %52 : f32
    %55 = arith.subf %53, %1 : f32
    %56 = arith.mulf %52, %55 : f32
    %57 = arith.mulf %11, %54 : f32
    %58 = arith.subf %46, %57 : f32
    %59 = arith.mulf %11, %56 : f32
    %60 = arith.addf %52, %59 : f32
    %61 = arith.mulf %0, %58 : f32
    %62 = arith.mulf %61, %60 : f32
    %63 = arith.subf %61, %1 : f32
    %64 = arith.mulf %60, %63 : f32
    %65 = arith.mulf %11, %62 : f32
    %66 = arith.subf %46, %65 : f32
    %67 = arith.mulf %11, %64 : f32
    %68 = arith.addf %52, %67 : f32
    %69 = arith.mulf %0, %66 : f32
    %70 = arith.mulf %69, %68 : f32
    %71 = arith.subf %69, %1 : f32
    %72 = arith.mulf %68, %71 : f32
    %73 = arith.mulf %10, %70 : f32
    %74 = arith.subf %46, %73 : f32
    %75 = arith.mulf %10, %72 : f32
    %76 = arith.addf %52, %75 : f32
    %77 = arith.mulf %0, %74 : f32
    %78 = arith.mulf %77, %76 : f32
    %79 = arith.subf %77, %1 : f32
    %80 = arith.mulf %76, %79 : f32
    %81 = arith.addf %62, %70 : f32
    %cst_12 = arith.constant 2.000000e+00 : f32
    %82 = arith.mulf %cst_12, %81 : f32
    %83 = arith.addf %54, %82 : f32
    %84 = arith.addf %83, %78 : f32
    %85 = arith.mulf %12, %84 : f32
    %86 = arith.subf %46, %85 : f32
    %87 = arith.addf %64, %72 : f32
    %cst_13 = arith.constant 2.000000e+00 : f32
    %88 = arith.mulf %cst_13, %87 : f32
    %89 = arith.addf %56, %88 : f32
    %90 = arith.addf %89, %80 : f32
    %91 = arith.mulf %12, %90 : f32
    %92 = arith.addf %52, %91 : f32
    %93 = arith.mulf %0, %86 : f32
    %94 = arith.mulf %93, %92 : f32
    %95 = arith.subf %93, %1 : f32
    %96 = arith.mulf %92, %95 : f32
    %97 = arith.mulf %11, %94 : f32
    %98 = arith.subf %86, %97 : f32
    %99 = arith.mulf %11, %96 : f32
    %100 = arith.addf %92, %99 : f32
    %101 = arith.mulf %0, %98 : f32
    %102 = arith.mulf %101, %100 : f32
    %103 = arith.subf %101, %1 : f32
    %104 = arith.mulf %100, %103 : f32
    %105 = arith.mulf %11, %102 : f32
    %106 = arith.subf %86, %105 : f32
    %107 = arith.mulf %11, %104 : f32
    %108 = arith.addf %92, %107 : f32
    %109 = arith.mulf %0, %106 : f32
    %110 = arith.mulf %109, %108 : f32
    %111 = arith.subf %109, %1 : f32
    %112 = arith.mulf %108, %111 : f32
    %113 = arith.mulf %10, %110 : f32
    %114 = arith.subf %86, %113 : f32
    %115 = arith.mulf %10, %112 : f32
    %116 = arith.addf %92, %115 : f32
    %117 = arith.mulf %0, %114 : f32
    %118 = arith.mulf %117, %116 : f32
    %119 = arith.subf %117, %1 : f32
    %120 = arith.mulf %116, %119 : f32
    %121 = arith.addf %102, %110 : f32
    %cst_14 = arith.constant 2.000000e+00 : f32
    %122 = arith.mulf %cst_14, %121 : f32
    %123 = arith.addf %94, %122 : f32
    %124 = arith.addf %123, %118 : f32
    %125 = arith.mulf %12, %124 : f32
    %126 = arith.subf %86, %125 : f32
    %127 = arith.addf %104, %112 : f32
    %cst_15 = arith.constant 2.000000e+00 : f32
    %128 = arith.mulf %cst_15, %127 : f32
    %129 = arith.addf %96, %128 : f32
    %130 = arith.addf %129, %120 : f32
    %131 = arith.mulf %12, %130 : f32
    %132 = arith.addf %92, %131 : f32
    %133 = arith.mulf %0, %126 : f32
    %134 = arith.mulf %133, %132 : f32
    %135 = arith.subf %133, %1 : f32
    %136 = arith.mulf %132, %135 : f32
    %137 = arith.mulf %11, %134 : f32
    %138 = arith.subf %126, %137 : f32
    %139 = arith.mulf %11, %136 : f32
    %140 = arith.addf %132, %139 : f32
    %141 = arith.mulf %0, %138 : f32
    %142 = arith.mulf %141, %140 : f32
    %143 = arith.subf %141, %1 : f32
    %144 = arith.mulf %140, %143 : f32
    %145 = arith.mulf %11, %142 : f32
    %146 = arith.subf %126, %145 : f32
    %147 = arith.mulf %11, %144 : f32
    %148 = arith.addf %132, %147 : f32
    %149 = arith.mulf %0, %146 : f32
    %150 = arith.mulf %149, %148 : f32
    %151 = arith.subf %149, %1 : f32
    %152 = arith.mulf %148, %151 : f32
    %153 = arith.mulf %10, %150 : f32
    %154 = arith.subf %126, %153 : f32
    %155 = arith.mulf %10, %152 : f32
    %156 = arith.addf %132, %155 : f32
    %157 = arith.mulf %0, %154 : f32
    %158 = arith.mulf %157, %156 : f32
    %159 = arith.subf %157, %1 : f32
    %160 = arith.mulf %156, %159 : f32
    %161 = arith.addf %142, %150 : f32
    %cst_16 = arith.constant 2.000000e+00 : f32
    %162 = arith.mulf %cst_16, %161 : f32
    %163 = arith.addf %134, %162 : f32
    %164 = arith.addf %163, %158 : f32
    %165 = arith.mulf %12, %164 : f32
    %166 = arith.subf %126, %165 : f32
    %167 = arith.addf %144, %152 : f32
    %cst_17 = arith.constant 2.000000e+00 : f32
    %168 = arith.mulf %cst_17, %167 : f32
    %169 = arith.addf %136, %168 : f32
    %170 = arith.addf %169, %160 : f32
    %171 = arith.mulf %12, %170 : f32
    %172 = arith.addf %132, %171 : f32
    %c1_18 = arith.constant 1 : index
    %c0_19 = arith.constant 0 : index
    %173 = memref.load %arg5[%c1_18, %c0_19] : memref<8x3xf32, #tpu.memory_space<smem>>
    memref.store %166, %arg5[%c1_18, %c0_19] : memref<8x3xf32, #tpu.memory_space<smem>>
    %c1_20 = arith.constant 1 : index
    %c1_21 = arith.constant 1 : index
    %174 = memref.load %arg5[%c1_20, %c1_21] : memref<8x3xf32, #tpu.memory_space<smem>>
    memref.store %172, %arg5[%c1_20, %c1_21] : memref<8x3xf32, #tpu.memory_space<smem>>
    %175 = arith.subf %6, %166 : f32
    %176 = arith.subf %175, %172 : f32
    %c1_22 = arith.constant 1 : index
    %c2_23 = arith.constant 2 : index
    %177 = memref.load %arg5[%c1_22, %c2_23] : memref<8x3xf32, #tpu.memory_space<smem>>
    memref.store %176, %arg5[%c1_22, %c2_23] : memref<8x3xf32, #tpu.memory_space<smem>>
    %c1_24 = arith.constant 1 : index
    %178 = memref.load %arg1[%c1_24] : memref<7xf32, #tpu.memory_space<smem>>
    %c1_25 = arith.constant 1 : index
    %179 = memref.load %arg2[%c1_25] : memref<7xf32, #tpu.memory_space<smem>>
    %c1_26 = arith.constant 1 : index
    %180 = memref.load %arg3[%c1_26] : memref<7xf32, #tpu.memory_space<smem>>
    %181 = arith.mulf %0, %166 : f32
    %182 = arith.mulf %181, %172 : f32
    %183 = arith.subf %181, %1 : f32
    %184 = arith.mulf %172, %183 : f32
    %185 = arith.mulf %179, %182 : f32
    %186 = arith.subf %166, %185 : f32
    %187 = arith.mulf %179, %184 : f32
    %188 = arith.addf %172, %187 : f32
    %189 = arith.mulf %0, %186 : f32
    %190 = arith.mulf %189, %188 : f32
    %191 = arith.subf %189, %1 : f32
    %192 = arith.mulf %188, %191 : f32
    %193 = arith.mulf %179, %190 : f32
    %194 = arith.subf %166, %193 : f32
    %195 = arith.mulf %179, %192 : f32
    %196 = arith.addf %172, %195 : f32
    %197 = arith.mulf %0, %194 : f32
    %198 = arith.mulf %197, %196 : f32
    %199 = arith.subf %197, %1 : f32
    %200 = arith.mulf %196, %199 : f32
    %201 = arith.mulf %178, %198 : f32
    %202 = arith.subf %166, %201 : f32
    %203 = arith.mulf %178, %200 : f32
    %204 = arith.addf %172, %203 : f32
    %205 = arith.mulf %0, %202 : f32
    %206 = arith.mulf %205, %204 : f32
    %207 = arith.subf %205, %1 : f32
    %208 = arith.mulf %204, %207 : f32
    %209 = arith.addf %190, %198 : f32
    %cst_27 = arith.constant 2.000000e+00 : f32
    %210 = arith.mulf %cst_27, %209 : f32
    %211 = arith.addf %182, %210 : f32
    %212 = arith.addf %211, %206 : f32
    %213 = arith.mulf %180, %212 : f32
    %214 = arith.subf %166, %213 : f32
    %215 = arith.addf %192, %200 : f32
    %cst_28 = arith.constant 2.000000e+00 : f32
    %216 = arith.mulf %cst_28, %215 : f32
    %217 = arith.addf %184, %216 : f32
    %218 = arith.addf %217, %208 : f32
    %219 = arith.mulf %180, %218 : f32
    %220 = arith.addf %172, %219 : f32
    %221 = arith.mulf %0, %214 : f32
    %222 = arith.mulf %221, %220 : f32
    %223 = arith.subf %221, %1 : f32
    %224 = arith.mulf %220, %223 : f32
    %225 = arith.mulf %179, %222 : f32
    %226 = arith.subf %214, %225 : f32
    %227 = arith.mulf %179, %224 : f32
    %228 = arith.addf %220, %227 : f32
    %229 = arith.mulf %0, %226 : f32
    %230 = arith.mulf %229, %228 : f32
    %231 = arith.subf %229, %1 : f32
    %232 = arith.mulf %228, %231 : f32
    %233 = arith.mulf %179, %230 : f32
    %234 = arith.subf %214, %233 : f32
    %235 = arith.mulf %179, %232 : f32
    %236 = arith.addf %220, %235 : f32
    %237 = arith.mulf %0, %234 : f32
    %238 = arith.mulf %237, %236 : f32
    %239 = arith.subf %237, %1 : f32
    %240 = arith.mulf %236, %239 : f32
    %241 = arith.mulf %178, %238 : f32
    %242 = arith.subf %214, %241 : f32
    %243 = arith.mulf %178, %240 : f32
    %244 = arith.addf %220, %243 : f32
    %245 = arith.mulf %0, %242 : f32
    %246 = arith.mulf %245, %244 : f32
    %247 = arith.subf %245, %1 : f32
    %248 = arith.mulf %244, %247 : f32
    %249 = arith.addf %230, %238 : f32
    %cst_29 = arith.constant 2.000000e+00 : f32
    %250 = arith.mulf %cst_29, %249 : f32
    %251 = arith.addf %222, %250 : f32
    %252 = arith.addf %251, %246 : f32
    %253 = arith.mulf %180, %252 : f32
    %254 = arith.subf %214, %253 : f32
    %255 = arith.addf %232, %240 : f32
    %cst_30 = arith.constant 2.000000e+00 : f32
    %256 = arith.mulf %cst_30, %255 : f32
    %257 = arith.addf %224, %256 : f32
    %258 = arith.addf %257, %248 : f32
    %259 = arith.mulf %180, %258 : f32
    %260 = arith.addf %220, %259 : f32
    %261 = arith.mulf %0, %254 : f32
    %262 = arith.mulf %261, %260 : f32
    %263 = arith.subf %261, %1 : f32
    %264 = arith.mulf %260, %263 : f32
    %265 = arith.mulf %179, %262 : f32
    %266 = arith.subf %254, %265 : f32
    %267 = arith.mulf %179, %264 : f32
    %268 = arith.addf %260, %267 : f32
    %269 = arith.mulf %0, %266 : f32
    %270 = arith.mulf %269, %268 : f32
    %271 = arith.subf %269, %1 : f32
    %272 = arith.mulf %268, %271 : f32
    %273 = arith.mulf %179, %270 : f32
    %274 = arith.subf %254, %273 : f32
    %275 = arith.mulf %179, %272 : f32
    %276 = arith.addf %260, %275 : f32
    %277 = arith.mulf %0, %274 : f32
    %278 = arith.mulf %277, %276 : f32
    %279 = arith.subf %277, %1 : f32
    %280 = arith.mulf %276, %279 : f32
    %281 = arith.mulf %178, %278 : f32
    %282 = arith.subf %254, %281 : f32
    %283 = arith.mulf %178, %280 : f32
    %284 = arith.addf %260, %283 : f32
    %285 = arith.mulf %0, %282 : f32
    %286 = arith.mulf %285, %284 : f32
    %287 = arith.subf %285, %1 : f32
    %288 = arith.mulf %284, %287 : f32
    %289 = arith.addf %270, %278 : f32
    %cst_31 = arith.constant 2.000000e+00 : f32
    %290 = arith.mulf %cst_31, %289 : f32
    %291 = arith.addf %262, %290 : f32
    %292 = arith.addf %291, %286 : f32
    %293 = arith.mulf %180, %292 : f32
    %294 = arith.subf %254, %293 : f32
    %295 = arith.addf %272, %280 : f32
    %cst_32 = arith.constant 2.000000e+00 : f32
    %296 = arith.mulf %cst_32, %295 : f32
    %297 = arith.addf %264, %296 : f32
    %298 = arith.addf %297, %288 : f32
    %299 = arith.mulf %180, %298 : f32
    %300 = arith.addf %260, %299 : f32
    %301 = arith.mulf %0, %294 : f32
    %302 = arith.mulf %301, %300 : f32
    %303 = arith.subf %301, %1 : f32
    %304 = arith.mulf %300, %303 : f32
    %305 = arith.mulf %179, %302 : f32
    %306 = arith.subf %294, %305 : f32
    %307 = arith.mulf %179, %304 : f32
    %308 = arith.addf %300, %307 : f32
    %309 = arith.mulf %0, %306 : f32
    %310 = arith.mulf %309, %308 : f32
    %311 = arith.subf %309, %1 : f32
    %312 = arith.mulf %308, %311 : f32
    %313 = arith.mulf %179, %310 : f32
    %314 = arith.subf %294, %313 : f32
    %315 = arith.mulf %179, %312 : f32
    %316 = arith.addf %300, %315 : f32
    %317 = arith.mulf %0, %314 : f32
    %318 = arith.mulf %317, %316 : f32
    %319 = arith.subf %317, %1 : f32
    %320 = arith.mulf %316, %319 : f32
    %321 = arith.mulf %178, %318 : f32
    %322 = arith.subf %294, %321 : f32
    %323 = arith.mulf %178, %320 : f32
    %324 = arith.addf %300, %323 : f32
    %325 = arith.mulf %0, %322 : f32
    %326 = arith.mulf %325, %324 : f32
    %327 = arith.subf %325, %1 : f32
    %328 = arith.mulf %324, %327 : f32
    %329 = arith.addf %310, %318 : f32
    %cst_33 = arith.constant 2.000000e+00 : f32
    %330 = arith.mulf %cst_33, %329 : f32
    %331 = arith.addf %302, %330 : f32
    %332 = arith.addf %331, %326 : f32
    %333 = arith.mulf %180, %332 : f32
    %334 = arith.subf %294, %333 : f32
    %335 = arith.addf %312, %320 : f32
    %cst_34 = arith.constant 2.000000e+00 : f32
    %336 = arith.mulf %cst_34, %335 : f32
    %337 = arith.addf %304, %336 : f32
    %338 = arith.addf %337, %328 : f32
    %339 = arith.mulf %180, %338 : f32
    %340 = arith.addf %300, %339 : f32
    %c2_35 = arith.constant 2 : index
    %c0_36 = arith.constant 0 : index
    %341 = memref.load %arg5[%c2_35, %c0_36] : memref<8x3xf32, #tpu.memory_space<smem>>
    memref.store %334, %arg5[%c2_35, %c0_36] : memref<8x3xf32, #tpu.memory_space<smem>>
    %c2_37 = arith.constant 2 : index
    %c1_38 = arith.constant 1 : index
    %342 = memref.load %arg5[%c2_37, %c1_38] : memref<8x3xf32, #tpu.memory_space<smem>>
    memref.store %340, %arg5[%c2_37, %c1_38] : memref<8x3xf32, #tpu.memory_space<smem>>
    %343 = arith.subf %6, %334 : f32
    %344 = arith.subf %343, %340 : f32
    %c2_39 = arith.constant 2 : index
    %c2_40 = arith.constant 2 : index
    %345 = memref.load %arg5[%c2_39, %c2_40] : memref<8x3xf32, #tpu.memory_space<smem>>
    memref.store %344, %arg5[%c2_39, %c2_40] : memref<8x3xf32, #tpu.memory_space<smem>>
    %c2_41 = arith.constant 2 : index
    %346 = memref.load %arg1[%c2_41] : memref<7xf32, #tpu.memory_space<smem>>
    %c2_42 = arith.constant 2 : index
    %347 = memref.load %arg2[%c2_42] : memref<7xf32, #tpu.memory_space<smem>>
    %c2_43 = arith.constant 2 : index
    %348 = memref.load %arg3[%c2_43] : memref<7xf32, #tpu.memory_space<smem>>
    %349 = arith.mulf %0, %334 : f32
    %350 = arith.mulf %349, %340 : f32
    %351 = arith.subf %349, %1 : f32
    %352 = arith.mulf %340, %351 : f32
    %353 = arith.mulf %347, %350 : f32
    %354 = arith.subf %334, %353 : f32
    %355 = arith.mulf %347, %352 : f32
    %356 = arith.addf %340, %355 : f32
    %357 = arith.mulf %0, %354 : f32
    %358 = arith.mulf %357, %356 : f32
    %359 = arith.subf %357, %1 : f32
    %360 = arith.mulf %356, %359 : f32
    %361 = arith.mulf %347, %358 : f32
    %362 = arith.subf %334, %361 : f32
    %363 = arith.mulf %347, %360 : f32
    %364 = arith.addf %340, %363 : f32
    %365 = arith.mulf %0, %362 : f32
    %366 = arith.mulf %365, %364 : f32
    %367 = arith.subf %365, %1 : f32
    %368 = arith.mulf %364, %367 : f32
    %369 = arith.mulf %346, %366 : f32
    %370 = arith.subf %334, %369 : f32
    %371 = arith.mulf %346, %368 : f32
    %372 = arith.addf %340, %371 : f32
    %373 = arith.mulf %0, %370 : f32
    %374 = arith.mulf %373, %372 : f32
    %375 = arith.subf %373, %1 : f32
    %376 = arith.mulf %372, %375 : f32
    %377 = arith.addf %358, %366 : f32
    %cst_44 = arith.constant 2.000000e+00 : f32
    %378 = arith.mulf %cst_44, %377 : f32
    %379 = arith.addf %350, %378 : f32
    %380 = arith.addf %379, %374 : f32
    %381 = arith.mulf %348, %380 : f32
    %382 = arith.subf %334, %381 : f32
    %383 = arith.addf %360, %368 : f32
    %cst_45 = arith.constant 2.000000e+00 : f32
    %384 = arith.mulf %cst_45, %383 : f32
    %385 = arith.addf %352, %384 : f32
    %386 = arith.addf %385, %376 : f32
    %387 = arith.mulf %348, %386 : f32
    %388 = arith.addf %340, %387 : f32
    %389 = arith.mulf %0, %382 : f32
    %390 = arith.mulf %389, %388 : f32
    %391 = arith.subf %389, %1 : f32
    %392 = arith.mulf %388, %391 : f32
    %393 = arith.mulf %347, %390 : f32
    %394 = arith.subf %382, %393 : f32
    %395 = arith.mulf %347, %392 : f32
    %396 = arith.addf %388, %395 : f32
    %397 = arith.mulf %0, %394 : f32
    %398 = arith.mulf %397, %396 : f32
    %399 = arith.subf %397, %1 : f32
    %400 = arith.mulf %396, %399 : f32
    %401 = arith.mulf %347, %398 : f32
    %402 = arith.subf %382, %401 : f32
    %403 = arith.mulf %347, %400 : f32
    %404 = arith.addf %388, %403 : f32
    %405 = arith.mulf %0, %402 : f32
    %406 = arith.mulf %405, %404 : f32
    %407 = arith.subf %405, %1 : f32
    %408 = arith.mulf %404, %407 : f32
    %409 = arith.mulf %346, %406 : f32
    %410 = arith.subf %382, %409 : f32
    %411 = arith.mulf %346, %408 : f32
    %412 = arith.addf %388, %411 : f32
    %413 = arith.mulf %0, %410 : f32
    %414 = arith.mulf %413, %412 : f32
    %415 = arith.subf %413, %1 : f32
    %416 = arith.mulf %412, %415 : f32
    %417 = arith.addf %398, %406 : f32
    %cst_46 = arith.constant 2.000000e+00 : f32
    %418 = arith.mulf %cst_46, %417 : f32
    %419 = arith.addf %390, %418 : f32
    %420 = arith.addf %419, %414 : f32
    %421 = arith.mulf %348, %420 : f32
    %422 = arith.subf %382, %421 : f32
    %423 = arith.addf %400, %408 : f32
    %cst_47 = arith.constant 2.000000e+00 : f32
    %424 = arith.mulf %cst_47, %423 : f32
    %425 = arith.addf %392, %424 : f32
    %426 = arith.addf %425, %416 : f32
    %427 = arith.mulf %348, %426 : f32
    %428 = arith.addf %388, %427 : f32
    %429 = arith.mulf %0, %422 : f32
    %430 = arith.mulf %429, %428 : f32
    %431 = arith.subf %429, %1 : f32
    %432 = arith.mulf %428, %431 : f32
    %433 = arith.mulf %347, %430 : f32
    %434 = arith.subf %422, %433 : f32
    %435 = arith.mulf %347, %432 : f32
    %436 = arith.addf %428, %435 : f32
    %437 = arith.mulf %0, %434 : f32
    %438 = arith.mulf %437, %436 : f32
    %439 = arith.subf %437, %1 : f32
    %440 = arith.mulf %436, %439 : f32
    %441 = arith.mulf %347, %438 : f32
    %442 = arith.subf %422, %441 : f32
    %443 = arith.mulf %347, %440 : f32
    %444 = arith.addf %428, %443 : f32
    %445 = arith.mulf %0, %442 : f32
    %446 = arith.mulf %445, %444 : f32
    %447 = arith.subf %445, %1 : f32
    %448 = arith.mulf %444, %447 : f32
    %449 = arith.mulf %346, %446 : f32
    %450 = arith.subf %422, %449 : f32
    %451 = arith.mulf %346, %448 : f32
    %452 = arith.addf %428, %451 : f32
    %453 = arith.mulf %0, %450 : f32
    %454 = arith.mulf %453, %452 : f32
    %455 = arith.subf %453, %1 : f32
    %456 = arith.mulf %452, %455 : f32
    %457 = arith.addf %438, %446 : f32
    %cst_48 = arith.constant 2.000000e+00 : f32
    %458 = arith.mulf %cst_48, %457 : f32
    %459 = arith.addf %430, %458 : f32
    %460 = arith.addf %459, %454 : f32
    %461 = arith.mulf %348, %460 : f32
    %462 = arith.subf %422, %461 : f32
    %463 = arith.addf %440, %448 : f32
    %cst_49 = arith.constant 2.000000e+00 : f32
    %464 = arith.mulf %cst_49, %463 : f32
    %465 = arith.addf %432, %464 : f32
    %466 = arith.addf %465, %456 : f32
    %467 = arith.mulf %348, %466 : f32
    %468 = arith.addf %428, %467 : f32
    %469 = arith.mulf %0, %462 : f32
    %470 = arith.mulf %469, %468 : f32
    %471 = arith.subf %469, %1 : f32
    %472 = arith.mulf %468, %471 : f32
    %473 = arith.mulf %347, %470 : f32
    %474 = arith.subf %462, %473 : f32
    %475 = arith.mulf %347, %472 : f32
    %476 = arith.addf %468, %475 : f32
    %477 = arith.mulf %0, %474 : f32
    %478 = arith.mulf %477, %476 : f32
    %479 = arith.subf %477, %1 : f32
    %480 = arith.mulf %476, %479 : f32
    %481 = arith.mulf %347, %478 : f32
    %482 = arith.subf %462, %481 : f32
    %483 = arith.mulf %347, %480 : f32
    %484 = arith.addf %468, %483 : f32
    %485 = arith.mulf %0, %482 : f32
    %486 = arith.mulf %485, %484 : f32
    %487 = arith.subf %485, %1 : f32
    %488 = arith.mulf %484, %487 : f32
    %489 = arith.mulf %346, %486 : f32
    %490 = arith.subf %462, %489 : f32
    %491 = arith.mulf %346, %488 : f32
    %492 = arith.addf %468, %491 : f32
    %493 = arith.mulf %0, %490 : f32
    %494 = arith.mulf %493, %492 : f32
    %495 = arith.subf %493, %1 : f32
    %496 = arith.mulf %492, %495 : f32
    %497 = arith.addf %478, %486 : f32
    %cst_50 = arith.constant 2.000000e+00 : f32
    %498 = arith.mulf %cst_50, %497 : f32
    %499 = arith.addf %470, %498 : f32
    %500 = arith.addf %499, %494 : f32
    %501 = arith.mulf %348, %500 : f32
    %502 = arith.subf %462, %501 : f32
    %503 = arith.addf %480, %488 : f32
    %cst_51 = arith.constant 2.000000e+00 : f32
    %504 = arith.mulf %cst_51, %503 : f32
    %505 = arith.addf %472, %504 : f32
    %506 = arith.addf %505, %496 : f32
    %507 = arith.mulf %348, %506 : f32
    %508 = arith.addf %468, %507 : f32
    %c3 = arith.constant 3 : index
    %c0_52 = arith.constant 0 : index
    %509 = memref.load %arg5[%c3, %c0_52] : memref<8x3xf32, #tpu.memory_space<smem>>
    memref.store %502, %arg5[%c3, %c0_52] : memref<8x3xf32, #tpu.memory_space<smem>>
    %c3_53 = arith.constant 3 : index
    %c1_54 = arith.constant 1 : index
    %510 = memref.load %arg5[%c3_53, %c1_54] : memref<8x3xf32, #tpu.memory_space<smem>>
    memref.store %508, %arg5[%c3_53, %c1_54] : memref<8x3xf32, #tpu.memory_space<smem>>
    %511 = arith.subf %6, %502 : f32
    %512 = arith.subf %511, %508 : f32
    %c3_55 = arith.constant 3 : index
    %c2_56 = arith.constant 2 : index
    %513 = memref.load %arg5[%c3_55, %c2_56] : memref<8x3xf32, #tpu.memory_space<smem>>
    memref.store %512, %arg5[%c3_55, %c2_56] : memref<8x3xf32, #tpu.memory_space<smem>>
    %c3_57 = arith.constant 3 : index
    %514 = memref.load %arg1[%c3_57] : memref<7xf32, #tpu.memory_space<smem>>
    %c3_58 = arith.constant 3 : index
    %515 = memref.load %arg2[%c3_58] : memref<7xf32, #tpu.memory_space<smem>>
    %c3_59 = arith.constant 3 : index
    %516 = memref.load %arg3[%c3_59] : memref<7xf32, #tpu.memory_space<smem>>
    %517 = arith.mulf %0, %502 : f32
    %518 = arith.mulf %517, %508 : f32
    %519 = arith.subf %517, %1 : f32
    %520 = arith.mulf %508, %519 : f32
    %521 = arith.mulf %515, %518 : f32
    %522 = arith.subf %502, %521 : f32
    %523 = arith.mulf %515, %520 : f32
    %524 = arith.addf %508, %523 : f32
    %525 = arith.mulf %0, %522 : f32
    %526 = arith.mulf %525, %524 : f32
    %527 = arith.subf %525, %1 : f32
    %528 = arith.mulf %524, %527 : f32
    %529 = arith.mulf %515, %526 : f32
    %530 = arith.subf %502, %529 : f32
    %531 = arith.mulf %515, %528 : f32
    %532 = arith.addf %508, %531 : f32
    %533 = arith.mulf %0, %530 : f32
    %534 = arith.mulf %533, %532 : f32
    %535 = arith.subf %533, %1 : f32
    %536 = arith.mulf %532, %535 : f32
    %537 = arith.mulf %514, %534 : f32
    %538 = arith.subf %502, %537 : f32
    %539 = arith.mulf %514, %536 : f32
    %540 = arith.addf %508, %539 : f32
    %541 = arith.mulf %0, %538 : f32
    %542 = arith.mulf %541, %540 : f32
    %543 = arith.subf %541, %1 : f32
    %544 = arith.mulf %540, %543 : f32
    %545 = arith.addf %526, %534 : f32
    %cst_60 = arith.constant 2.000000e+00 : f32
    %546 = arith.mulf %cst_60, %545 : f32
    %547 = arith.addf %518, %546 : f32
    %548 = arith.addf %547, %542 : f32
    %549 = arith.mulf %516, %548 : f32
    %550 = arith.subf %502, %549 : f32
    %551 = arith.addf %528, %536 : f32
    %cst_61 = arith.constant 2.000000e+00 : f32
    %552 = arith.mulf %cst_61, %551 : f32
    %553 = arith.addf %520, %552 : f32
    %554 = arith.addf %553, %544 : f32
    %555 = arith.mulf %516, %554 : f32
    %556 = arith.addf %508, %555 : f32
    %557 = arith.mulf %0, %550 : f32
    %558 = arith.mulf %557, %556 : f32
    %559 = arith.subf %557, %1 : f32
    %560 = arith.mulf %556, %559 : f32
    %561 = arith.mulf %515, %558 : f32
    %562 = arith.subf %550, %561 : f32
    %563 = arith.mulf %515, %560 : f32
    %564 = arith.addf %556, %563 : f32
    %565 = arith.mulf %0, %562 : f32
    %566 = arith.mulf %565, %564 : f32
    %567 = arith.subf %565, %1 : f32
    %568 = arith.mulf %564, %567 : f32
    %569 = arith.mulf %515, %566 : f32
    %570 = arith.subf %550, %569 : f32
    %571 = arith.mulf %515, %568 : f32
    %572 = arith.addf %556, %571 : f32
    %573 = arith.mulf %0, %570 : f32
    %574 = arith.mulf %573, %572 : f32
    %575 = arith.subf %573, %1 : f32
    %576 = arith.mulf %572, %575 : f32
    %577 = arith.mulf %514, %574 : f32
    %578 = arith.subf %550, %577 : f32
    %579 = arith.mulf %514, %576 : f32
    %580 = arith.addf %556, %579 : f32
    %581 = arith.mulf %0, %578 : f32
    %582 = arith.mulf %581, %580 : f32
    %583 = arith.subf %581, %1 : f32
    %584 = arith.mulf %580, %583 : f32
    %585 = arith.addf %566, %574 : f32
    %cst_62 = arith.constant 2.000000e+00 : f32
    %586 = arith.mulf %cst_62, %585 : f32
    %587 = arith.addf %558, %586 : f32
    %588 = arith.addf %587, %582 : f32
    %589 = arith.mulf %516, %588 : f32
    %590 = arith.subf %550, %589 : f32
    %591 = arith.addf %568, %576 : f32
    %cst_63 = arith.constant 2.000000e+00 : f32
    %592 = arith.mulf %cst_63, %591 : f32
    %593 = arith.addf %560, %592 : f32
    %594 = arith.addf %593, %584 : f32
    %595 = arith.mulf %516, %594 : f32
    %596 = arith.addf %556, %595 : f32
    %597 = arith.mulf %0, %590 : f32
    %598 = arith.mulf %597, %596 : f32
    %599 = arith.subf %597, %1 : f32
    %600 = arith.mulf %596, %599 : f32
    %601 = arith.mulf %515, %598 : f32
    %602 = arith.subf %590, %601 : f32
    %603 = arith.mulf %515, %600 : f32
    %604 = arith.addf %596, %603 : f32
    %605 = arith.mulf %0, %602 : f32
    %606 = arith.mulf %605, %604 : f32
    %607 = arith.subf %605, %1 : f32
    %608 = arith.mulf %604, %607 : f32
    %609 = arith.mulf %515, %606 : f32
    %610 = arith.subf %590, %609 : f32
    %611 = arith.mulf %515, %608 : f32
    %612 = arith.addf %596, %611 : f32
    %613 = arith.mulf %0, %610 : f32
    %614 = arith.mulf %613, %612 : f32
    %615 = arith.subf %613, %1 : f32
    %616 = arith.mulf %612, %615 : f32
    %617 = arith.mulf %514, %614 : f32
    %618 = arith.subf %590, %617 : f32
    %619 = arith.mulf %514, %616 : f32
    %620 = arith.addf %596, %619 : f32
    %621 = arith.mulf %0, %618 : f32
    %622 = arith.mulf %621, %620 : f32
    %623 = arith.subf %621, %1 : f32
    %624 = arith.mulf %620, %623 : f32
    %625 = arith.addf %606, %614 : f32
    %cst_64 = arith.constant 2.000000e+00 : f32
    %626 = arith.mulf %cst_64, %625 : f32
    %627 = arith.addf %598, %626 : f32
    %628 = arith.addf %627, %622 : f32
    %629 = arith.mulf %516, %628 : f32
    %630 = arith.subf %590, %629 : f32
    %631 = arith.addf %608, %616 : f32
    %cst_65 = arith.constant 2.000000e+00 : f32
    %632 = arith.mulf %cst_65, %631 : f32
    %633 = arith.addf %600, %632 : f32
    %634 = arith.addf %633, %624 : f32
    %635 = arith.mulf %516, %634 : f32
    %636 = arith.addf %596, %635 : f32
    %637 = arith.mulf %0, %630 : f32
    %638 = arith.mulf %637, %636 : f32
    %639 = arith.subf %637, %1 : f32
    %640 = arith.mulf %636, %639 : f32
    %641 = arith.mulf %515, %638 : f32
    %642 = arith.subf %630, %641 : f32
    %643 = arith.mulf %515, %640 : f32
    %644 = arith.addf %636, %643 : f32
    %645 = arith.mulf %0, %642 : f32
    %646 = arith.mulf %645, %644 : f32
    %647 = arith.subf %645, %1 : f32
    %648 = arith.mulf %644, %647 : f32
    %649 = arith.mulf %515, %646 : f32
    %650 = arith.subf %630, %649 : f32
    %651 = arith.mulf %515, %648 : f32
    %652 = arith.addf %636, %651 : f32
    %653 = arith.mulf %0, %650 : f32
    %654 = arith.mulf %653, %652 : f32
    %655 = arith.subf %653, %1 : f32
    %656 = arith.mulf %652, %655 : f32
    %657 = arith.mulf %514, %654 : f32
    %658 = arith.subf %630, %657 : f32
    %659 = arith.mulf %514, %656 : f32
    %660 = arith.addf %636, %659 : f32
    %661 = arith.mulf %0, %658 : f32
    %662 = arith.mulf %661, %660 : f32
    %663 = arith.subf %661, %1 : f32
    %664 = arith.mulf %660, %663 : f32
    %665 = arith.addf %646, %654 : f32
    %cst_66 = arith.constant 2.000000e+00 : f32
    %666 = arith.mulf %cst_66, %665 : f32
    %667 = arith.addf %638, %666 : f32
    %668 = arith.addf %667, %662 : f32
    %669 = arith.mulf %516, %668 : f32
    %670 = arith.subf %630, %669 : f32
    %671 = arith.addf %648, %656 : f32
    %cst_67 = arith.constant 2.000000e+00 : f32
    %672 = arith.mulf %cst_67, %671 : f32
    %673 = arith.addf %640, %672 : f32
    %674 = arith.addf %673, %664 : f32
    %675 = arith.mulf %516, %674 : f32
    %676 = arith.addf %636, %675 : f32
    %c4 = arith.constant 4 : index
    %c0_68 = arith.constant 0 : index
    %677 = memref.load %arg5[%c4, %c0_68] : memref<8x3xf32, #tpu.memory_space<smem>>
    memref.store %670, %arg5[%c4, %c0_68] : memref<8x3xf32, #tpu.memory_space<smem>>
    %c4_69 = arith.constant 4 : index
    %c1_70 = arith.constant 1 : index
    %678 = memref.load %arg5[%c4_69, %c1_70] : memref<8x3xf32, #tpu.memory_space<smem>>
    memref.store %676, %arg5[%c4_69, %c1_70] : memref<8x3xf32, #tpu.memory_space<smem>>
    %679 = arith.subf %6, %670 : f32
    %680 = arith.subf %679, %676 : f32
    %c4_71 = arith.constant 4 : index
    %c2_72 = arith.constant 2 : index
    %681 = memref.load %arg5[%c4_71, %c2_72] : memref<8x3xf32, #tpu.memory_space<smem>>
    memref.store %680, %arg5[%c4_71, %c2_72] : memref<8x3xf32, #tpu.memory_space<smem>>
    %c4_73 = arith.constant 4 : index
    %682 = memref.load %arg1[%c4_73] : memref<7xf32, #tpu.memory_space<smem>>
    %c4_74 = arith.constant 4 : index
    %683 = memref.load %arg2[%c4_74] : memref<7xf32, #tpu.memory_space<smem>>
    %c4_75 = arith.constant 4 : index
    %684 = memref.load %arg3[%c4_75] : memref<7xf32, #tpu.memory_space<smem>>
    %685 = arith.mulf %0, %670 : f32
    %686 = arith.mulf %685, %676 : f32
    %687 = arith.subf %685, %1 : f32
    %688 = arith.mulf %676, %687 : f32
    %689 = arith.mulf %683, %686 : f32
    %690 = arith.subf %670, %689 : f32
    %691 = arith.mulf %683, %688 : f32
    %692 = arith.addf %676, %691 : f32
    %693 = arith.mulf %0, %690 : f32
    %694 = arith.mulf %693, %692 : f32
    %695 = arith.subf %693, %1 : f32
    %696 = arith.mulf %692, %695 : f32
    %697 = arith.mulf %683, %694 : f32
    %698 = arith.subf %670, %697 : f32
    %699 = arith.mulf %683, %696 : f32
    %700 = arith.addf %676, %699 : f32
    %701 = arith.mulf %0, %698 : f32
    %702 = arith.mulf %701, %700 : f32
    %703 = arith.subf %701, %1 : f32
    %704 = arith.mulf %700, %703 : f32
    %705 = arith.mulf %682, %702 : f32
    %706 = arith.subf %670, %705 : f32
    %707 = arith.mulf %682, %704 : f32
    %708 = arith.addf %676, %707 : f32
    %709 = arith.mulf %0, %706 : f32
    %710 = arith.mulf %709, %708 : f32
    %711 = arith.subf %709, %1 : f32
    %712 = arith.mulf %708, %711 : f32
    %713 = arith.addf %694, %702 : f32
    %cst_76 = arith.constant 2.000000e+00 : f32
    %714 = arith.mulf %cst_76, %713 : f32
    %715 = arith.addf %686, %714 : f32
    %716 = arith.addf %715, %710 : f32
    %717 = arith.mulf %684, %716 : f32
    %718 = arith.subf %670, %717 : f32
    %719 = arith.addf %696, %704 : f32
    %cst_77 = arith.constant 2.000000e+00 : f32
    %720 = arith.mulf %cst_77, %719 : f32
    %721 = arith.addf %688, %720 : f32
    %722 = arith.addf %721, %712 : f32
    %723 = arith.mulf %684, %722 : f32
    %724 = arith.addf %676, %723 : f32
    %725 = arith.mulf %0, %718 : f32
    %726 = arith.mulf %725, %724 : f32
    %727 = arith.subf %725, %1 : f32
    %728 = arith.mulf %724, %727 : f32
    %729 = arith.mulf %683, %726 : f32
    %730 = arith.subf %718, %729 : f32
    %731 = arith.mulf %683, %728 : f32
    %732 = arith.addf %724, %731 : f32
    %733 = arith.mulf %0, %730 : f32
    %734 = arith.mulf %733, %732 : f32
    %735 = arith.subf %733, %1 : f32
    %736 = arith.mulf %732, %735 : f32
    %737 = arith.mulf %683, %734 : f32
    %738 = arith.subf %718, %737 : f32
    %739 = arith.mulf %683, %736 : f32
    %740 = arith.addf %724, %739 : f32
    %741 = arith.mulf %0, %738 : f32
    %742 = arith.mulf %741, %740 : f32
    %743 = arith.subf %741, %1 : f32
    %744 = arith.mulf %740, %743 : f32
    %745 = arith.mulf %682, %742 : f32
    %746 = arith.subf %718, %745 : f32
    %747 = arith.mulf %682, %744 : f32
    %748 = arith.addf %724, %747 : f32
    %749 = arith.mulf %0, %746 : f32
    %750 = arith.mulf %749, %748 : f32
    %751 = arith.subf %749, %1 : f32
    %752 = arith.mulf %748, %751 : f32
    %753 = arith.addf %734, %742 : f32
    %cst_78 = arith.constant 2.000000e+00 : f32
    %754 = arith.mulf %cst_78, %753 : f32
    %755 = arith.addf %726, %754 : f32
    %756 = arith.addf %755, %750 : f32
    %757 = arith.mulf %684, %756 : f32
    %758 = arith.subf %718, %757 : f32
    %759 = arith.addf %736, %744 : f32
    %cst_79 = arith.constant 2.000000e+00 : f32
    %760 = arith.mulf %cst_79, %759 : f32
    %761 = arith.addf %728, %760 : f32
    %762 = arith.addf %761, %752 : f32
    %763 = arith.mulf %684, %762 : f32
    %764 = arith.addf %724, %763 : f32
    %765 = arith.mulf %0, %758 : f32
    %766 = arith.mulf %765, %764 : f32
    %767 = arith.subf %765, %1 : f32
    %768 = arith.mulf %764, %767 : f32
    %769 = arith.mulf %683, %766 : f32
    %770 = arith.subf %758, %769 : f32
    %771 = arith.mulf %683, %768 : f32
    %772 = arith.addf %764, %771 : f32
    %773 = arith.mulf %0, %770 : f32
    %774 = arith.mulf %773, %772 : f32
    %775 = arith.subf %773, %1 : f32
    %776 = arith.mulf %772, %775 : f32
    %777 = arith.mulf %683, %774 : f32
    %778 = arith.subf %758, %777 : f32
    %779 = arith.mulf %683, %776 : f32
    %780 = arith.addf %764, %779 : f32
    %781 = arith.mulf %0, %778 : f32
    %782 = arith.mulf %781, %780 : f32
    %783 = arith.subf %781, %1 : f32
    %784 = arith.mulf %780, %783 : f32
    %785 = arith.mulf %682, %782 : f32
    %786 = arith.subf %758, %785 : f32
    %787 = arith.mulf %682, %784 : f32
    %788 = arith.addf %764, %787 : f32
    %789 = arith.mulf %0, %786 : f32
    %790 = arith.mulf %789, %788 : f32
    %791 = arith.subf %789, %1 : f32
    %792 = arith.mulf %788, %791 : f32
    %793 = arith.addf %774, %782 : f32
    %cst_80 = arith.constant 2.000000e+00 : f32
    %794 = arith.mulf %cst_80, %793 : f32
    %795 = arith.addf %766, %794 : f32
    %796 = arith.addf %795, %790 : f32
    %797 = arith.mulf %684, %796 : f32
    %798 = arith.subf %758, %797 : f32
    %799 = arith.addf %776, %784 : f32
    %cst_81 = arith.constant 2.000000e+00 : f32
    %800 = arith.mulf %cst_81, %799 : f32
    %801 = arith.addf %768, %800 : f32
    %802 = arith.addf %801, %792 : f32
    %803 = arith.mulf %684, %802 : f32
    %804 = arith.addf %764, %803 : f32
    %805 = arith.mulf %0, %798 : f32
    %806 = arith.mulf %805, %804 : f32
    %807 = arith.subf %805, %1 : f32
    %808 = arith.mulf %804, %807 : f32
    %809 = arith.mulf %683, %806 : f32
    %810 = arith.subf %798, %809 : f32
    %811 = arith.mulf %683, %808 : f32
    %812 = arith.addf %804, %811 : f32
    %813 = arith.mulf %0, %810 : f32
    %814 = arith.mulf %813, %812 : f32
    %815 = arith.subf %813, %1 : f32
    %816 = arith.mulf %812, %815 : f32
    %817 = arith.mulf %683, %814 : f32
    %818 = arith.subf %798, %817 : f32
    %819 = arith.mulf %683, %816 : f32
    %820 = arith.addf %804, %819 : f32
    %821 = arith.mulf %0, %818 : f32
    %822 = arith.mulf %821, %820 : f32
    %823 = arith.subf %821, %1 : f32
    %824 = arith.mulf %820, %823 : f32
    %825 = arith.mulf %682, %822 : f32
    %826 = arith.subf %798, %825 : f32
    %827 = arith.mulf %682, %824 : f32
    %828 = arith.addf %804, %827 : f32
    %829 = arith.mulf %0, %826 : f32
    %830 = arith.mulf %829, %828 : f32
    %831 = arith.subf %829, %1 : f32
    %832 = arith.mulf %828, %831 : f32
    %833 = arith.addf %814, %822 : f32
    %cst_82 = arith.constant 2.000000e+00 : f32
    %834 = arith.mulf %cst_82, %833 : f32
    %835 = arith.addf %806, %834 : f32
    %836 = arith.addf %835, %830 : f32
    %837 = arith.mulf %684, %836 : f32
    %838 = arith.subf %798, %837 : f32
    %839 = arith.addf %816, %824 : f32
    %cst_83 = arith.constant 2.000000e+00 : f32
    %840 = arith.mulf %cst_83, %839 : f32
    %841 = arith.addf %808, %840 : f32
    %842 = arith.addf %841, %832 : f32
    %843 = arith.mulf %684, %842 : f32
    %844 = arith.addf %804, %843 : f32
    %c5 = arith.constant 5 : index
    %c0_84 = arith.constant 0 : index
    %845 = memref.load %arg5[%c5, %c0_84] : memref<8x3xf32, #tpu.memory_space<smem>>
    memref.store %838, %arg5[%c5, %c0_84] : memref<8x3xf32, #tpu.memory_space<smem>>
    %c5_85 = arith.constant 5 : index
    %c1_86 = arith.constant 1 : index
    %846 = memref.load %arg5[%c5_85, %c1_86] : memref<8x3xf32, #tpu.memory_space<smem>>
    memref.store %844, %arg5[%c5_85, %c1_86] : memref<8x3xf32, #tpu.memory_space<smem>>
    %847 = arith.subf %6, %838 : f32
    %848 = arith.subf %847, %844 : f32
    %c5_87 = arith.constant 5 : index
    %c2_88 = arith.constant 2 : index
    %849 = memref.load %arg5[%c5_87, %c2_88] : memref<8x3xf32, #tpu.memory_space<smem>>
    memref.store %848, %arg5[%c5_87, %c2_88] : memref<8x3xf32, #tpu.memory_space<smem>>
    %c5_89 = arith.constant 5 : index
    %850 = memref.load %arg1[%c5_89] : memref<7xf32, #tpu.memory_space<smem>>
    %c5_90 = arith.constant 5 : index
    %851 = memref.load %arg2[%c5_90] : memref<7xf32, #tpu.memory_space<smem>>
    %c5_91 = arith.constant 5 : index
    %852 = memref.load %arg3[%c5_91] : memref<7xf32, #tpu.memory_space<smem>>
    %853 = arith.mulf %0, %838 : f32
    %854 = arith.mulf %853, %844 : f32
    %855 = arith.subf %853, %1 : f32
    %856 = arith.mulf %844, %855 : f32
    %857 = arith.mulf %851, %854 : f32
    %858 = arith.subf %838, %857 : f32
    %859 = arith.mulf %851, %856 : f32
    %860 = arith.addf %844, %859 : f32
    %861 = arith.mulf %0, %858 : f32
    %862 = arith.mulf %861, %860 : f32
    %863 = arith.subf %861, %1 : f32
    %864 = arith.mulf %860, %863 : f32
    %865 = arith.mulf %851, %862 : f32
    %866 = arith.subf %838, %865 : f32
    %867 = arith.mulf %851, %864 : f32
    %868 = arith.addf %844, %867 : f32
    %869 = arith.mulf %0, %866 : f32
    %870 = arith.mulf %869, %868 : f32
    %871 = arith.subf %869, %1 : f32
    %872 = arith.mulf %868, %871 : f32
    %873 = arith.mulf %850, %870 : f32
    %874 = arith.subf %838, %873 : f32
    %875 = arith.mulf %850, %872 : f32
    %876 = arith.addf %844, %875 : f32
    %877 = arith.mulf %0, %874 : f32
    %878 = arith.mulf %877, %876 : f32
    %879 = arith.subf %877, %1 : f32
    %880 = arith.mulf %876, %879 : f32
    %881 = arith.addf %862, %870 : f32
    %cst_92 = arith.constant 2.000000e+00 : f32
    %882 = arith.mulf %cst_92, %881 : f32
    %883 = arith.addf %854, %882 : f32
    %884 = arith.addf %883, %878 : f32
    %885 = arith.mulf %852, %884 : f32
    %886 = arith.subf %838, %885 : f32
    %887 = arith.addf %864, %872 : f32
    %cst_93 = arith.constant 2.000000e+00 : f32
    %888 = arith.mulf %cst_93, %887 : f32
    %889 = arith.addf %856, %888 : f32
    %890 = arith.addf %889, %880 : f32
    %891 = arith.mulf %852, %890 : f32
    %892 = arith.addf %844, %891 : f32
    %893 = arith.mulf %0, %886 : f32
    %894 = arith.mulf %893, %892 : f32
    %895 = arith.subf %893, %1 : f32
    %896 = arith.mulf %892, %895 : f32
    %897 = arith.mulf %851, %894 : f32
    %898 = arith.subf %886, %897 : f32
    %899 = arith.mulf %851, %896 : f32
    %900 = arith.addf %892, %899 : f32
    %901 = arith.mulf %0, %898 : f32
    %902 = arith.mulf %901, %900 : f32
    %903 = arith.subf %901, %1 : f32
    %904 = arith.mulf %900, %903 : f32
    %905 = arith.mulf %851, %902 : f32
    %906 = arith.subf %886, %905 : f32
    %907 = arith.mulf %851, %904 : f32
    %908 = arith.addf %892, %907 : f32
    %909 = arith.mulf %0, %906 : f32
    %910 = arith.mulf %909, %908 : f32
    %911 = arith.subf %909, %1 : f32
    %912 = arith.mulf %908, %911 : f32
    %913 = arith.mulf %850, %910 : f32
    %914 = arith.subf %886, %913 : f32
    %915 = arith.mulf %850, %912 : f32
    %916 = arith.addf %892, %915 : f32
    %917 = arith.mulf %0, %914 : f32
    %918 = arith.mulf %917, %916 : f32
    %919 = arith.subf %917, %1 : f32
    %920 = arith.mulf %916, %919 : f32
    %921 = arith.addf %902, %910 : f32
    %cst_94 = arith.constant 2.000000e+00 : f32
    %922 = arith.mulf %cst_94, %921 : f32
    %923 = arith.addf %894, %922 : f32
    %924 = arith.addf %923, %918 : f32
    %925 = arith.mulf %852, %924 : f32
    %926 = arith.subf %886, %925 : f32
    %927 = arith.addf %904, %912 : f32
    %cst_95 = arith.constant 2.000000e+00 : f32
    %928 = arith.mulf %cst_95, %927 : f32
    %929 = arith.addf %896, %928 : f32
    %930 = arith.addf %929, %920 : f32
    %931 = arith.mulf %852, %930 : f32
    %932 = arith.addf %892, %931 : f32
    %933 = arith.mulf %0, %926 : f32
    %934 = arith.mulf %933, %932 : f32
    %935 = arith.subf %933, %1 : f32
    %936 = arith.mulf %932, %935 : f32
    %937 = arith.mulf %851, %934 : f32
    %938 = arith.subf %926, %937 : f32
    %939 = arith.mulf %851, %936 : f32
    %940 = arith.addf %932, %939 : f32
    %941 = arith.mulf %0, %938 : f32
    %942 = arith.mulf %941, %940 : f32
    %943 = arith.subf %941, %1 : f32
    %944 = arith.mulf %940, %943 : f32
    %945 = arith.mulf %851, %942 : f32
    %946 = arith.subf %926, %945 : f32
    %947 = arith.mulf %851, %944 : f32
    %948 = arith.addf %932, %947 : f32
    %949 = arith.mulf %0, %946 : f32
    %950 = arith.mulf %949, %948 : f32
    %951 = arith.subf %949, %1 : f32
    %952 = arith.mulf %948, %951 : f32
    %953 = arith.mulf %850, %950 : f32
    %954 = arith.subf %926, %953 : f32
    %955 = arith.mulf %850, %952 : f32
    %956 = arith.addf %932, %955 : f32
    %957 = arith.mulf %0, %954 : f32
    %958 = arith.mulf %957, %956 : f32
    %959 = arith.subf %957, %1 : f32
    %960 = arith.mulf %956, %959 : f32
    %961 = arith.addf %942, %950 : f32
    %cst_96 = arith.constant 2.000000e+00 : f32
    %962 = arith.mulf %cst_96, %961 : f32
    %963 = arith.addf %934, %962 : f32
    %964 = arith.addf %963, %958 : f32
    %965 = arith.mulf %852, %964 : f32
    %966 = arith.subf %926, %965 : f32
    %967 = arith.addf %944, %952 : f32
    %cst_97 = arith.constant 2.000000e+00 : f32
    %968 = arith.mulf %cst_97, %967 : f32
    %969 = arith.addf %936, %968 : f32
    %970 = arith.addf %969, %960 : f32
    %971 = arith.mulf %852, %970 : f32
    %972 = arith.addf %932, %971 : f32
    %973 = arith.mulf %0, %966 : f32
    %974 = arith.mulf %973, %972 : f32
    %975 = arith.subf %973, %1 : f32
    %976 = arith.mulf %972, %975 : f32
    %977 = arith.mulf %851, %974 : f32
    %978 = arith.subf %966, %977 : f32
    %979 = arith.mulf %851, %976 : f32
    %980 = arith.addf %972, %979 : f32
    %981 = arith.mulf %0, %978 : f32
    %982 = arith.mulf %981, %980 : f32
    %983 = arith.subf %981, %1 : f32
    %984 = arith.mulf %980, %983 : f32
    %985 = arith.mulf %851, %982 : f32
    %986 = arith.subf %966, %985 : f32
    %987 = arith.mulf %851, %984 : f32
    %988 = arith.addf %972, %987 : f32
    %989 = arith.mulf %0, %986 : f32
    %990 = arith.mulf %989, %988 : f32
    %991 = arith.subf %989, %1 : f32
    %992 = arith.mulf %988, %991 : f32
    %993 = arith.mulf %850, %990 : f32
    %994 = arith.subf %966, %993 : f32
    %995 = arith.mulf %850, %992 : f32
    %996 = arith.addf %972, %995 : f32
    %997 = arith.mulf %0, %994 : f32
    %998 = arith.mulf %997, %996 : f32
    %999 = arith.subf %997, %1 : f32
    %1000 = arith.mulf %996, %999 : f32
    %1001 = arith.addf %982, %990 : f32
    %cst_98 = arith.constant 2.000000e+00 : f32
    %1002 = arith.mulf %cst_98, %1001 : f32
    %1003 = arith.addf %974, %1002 : f32
    %1004 = arith.addf %1003, %998 : f32
    %1005 = arith.mulf %852, %1004 : f32
    %1006 = arith.subf %966, %1005 : f32
    %1007 = arith.addf %984, %992 : f32
    %cst_99 = arith.constant 2.000000e+00 : f32
    %1008 = arith.mulf %cst_99, %1007 : f32
    %1009 = arith.addf %976, %1008 : f32
    %1010 = arith.addf %1009, %1000 : f32
    %1011 = arith.mulf %852, %1010 : f32
    %1012 = arith.addf %972, %1011 : f32
    %c6 = arith.constant 6 : index
    %c0_100 = arith.constant 0 : index
    %1013 = memref.load %arg5[%c6, %c0_100] : memref<8x3xf32, #tpu.memory_space<smem>>
    memref.store %1006, %arg5[%c6, %c0_100] : memref<8x3xf32, #tpu.memory_space<smem>>
    %c6_101 = arith.constant 6 : index
    %c1_102 = arith.constant 1 : index
    %1014 = memref.load %arg5[%c6_101, %c1_102] : memref<8x3xf32, #tpu.memory_space<smem>>
    memref.store %1012, %arg5[%c6_101, %c1_102] : memref<8x3xf32, #tpu.memory_space<smem>>
    %1015 = arith.subf %6, %1006 : f32
    %1016 = arith.subf %1015, %1012 : f32
    %c6_103 = arith.constant 6 : index
    %c2_104 = arith.constant 2 : index
    %1017 = memref.load %arg5[%c6_103, %c2_104] : memref<8x3xf32, #tpu.memory_space<smem>>
    memref.store %1016, %arg5[%c6_103, %c2_104] : memref<8x3xf32, #tpu.memory_space<smem>>
    %c6_105 = arith.constant 6 : index
    %1018 = memref.load %arg1[%c6_105] : memref<7xf32, #tpu.memory_space<smem>>
    %c6_106 = arith.constant 6 : index
    %1019 = memref.load %arg2[%c6_106] : memref<7xf32, #tpu.memory_space<smem>>
    %c6_107 = arith.constant 6 : index
    %1020 = memref.load %arg3[%c6_107] : memref<7xf32, #tpu.memory_space<smem>>
    %1021 = arith.mulf %0, %1006 : f32
    %1022 = arith.mulf %1021, %1012 : f32
    %1023 = arith.subf %1021, %1 : f32
    %1024 = arith.mulf %1012, %1023 : f32
    %1025 = arith.mulf %1019, %1022 : f32
    %1026 = arith.subf %1006, %1025 : f32
    %1027 = arith.mulf %1019, %1024 : f32
    %1028 = arith.addf %1012, %1027 : f32
    %1029 = arith.mulf %0, %1026 : f32
    %1030 = arith.mulf %1029, %1028 : f32
    %1031 = arith.subf %1029, %1 : f32
    %1032 = arith.mulf %1028, %1031 : f32
    %1033 = arith.mulf %1019, %1030 : f32
    %1034 = arith.subf %1006, %1033 : f32
    %1035 = arith.mulf %1019, %1032 : f32
    %1036 = arith.addf %1012, %1035 : f32
    %1037 = arith.mulf %0, %1034 : f32
    %1038 = arith.mulf %1037, %1036 : f32
    %1039 = arith.subf %1037, %1 : f32
    %1040 = arith.mulf %1036, %1039 : f32
    %1041 = arith.mulf %1018, %1038 : f32
    %1042 = arith.subf %1006, %1041 : f32
    %1043 = arith.mulf %1018, %1040 : f32
    %1044 = arith.addf %1012, %1043 : f32
    %1045 = arith.mulf %0, %1042 : f32
    %1046 = arith.mulf %1045, %1044 : f32
    %1047 = arith.subf %1045, %1 : f32
    %1048 = arith.mulf %1044, %1047 : f32
    %1049 = arith.addf %1030, %1038 : f32
    %cst_108 = arith.constant 2.000000e+00 : f32
    %1050 = arith.mulf %cst_108, %1049 : f32
    %1051 = arith.addf %1022, %1050 : f32
    %1052 = arith.addf %1051, %1046 : f32
    %1053 = arith.mulf %1020, %1052 : f32
    %1054 = arith.subf %1006, %1053 : f32
    %1055 = arith.addf %1032, %1040 : f32
    %cst_109 = arith.constant 2.000000e+00 : f32
    %1056 = arith.mulf %cst_109, %1055 : f32
    %1057 = arith.addf %1024, %1056 : f32
    %1058 = arith.addf %1057, %1048 : f32
    %1059 = arith.mulf %1020, %1058 : f32
    %1060 = arith.addf %1012, %1059 : f32
    %1061 = arith.mulf %0, %1054 : f32
    %1062 = arith.mulf %1061, %1060 : f32
    %1063 = arith.subf %1061, %1 : f32
    %1064 = arith.mulf %1060, %1063 : f32
    %1065 = arith.mulf %1019, %1062 : f32
    %1066 = arith.subf %1054, %1065 : f32
    %1067 = arith.mulf %1019, %1064 : f32
    %1068 = arith.addf %1060, %1067 : f32
    %1069 = arith.mulf %0, %1066 : f32
    %1070 = arith.mulf %1069, %1068 : f32
    %1071 = arith.subf %1069, %1 : f32
    %1072 = arith.mulf %1068, %1071 : f32
    %1073 = arith.mulf %1019, %1070 : f32
    %1074 = arith.subf %1054, %1073 : f32
    %1075 = arith.mulf %1019, %1072 : f32
    %1076 = arith.addf %1060, %1075 : f32
    %1077 = arith.mulf %0, %1074 : f32
    %1078 = arith.mulf %1077, %1076 : f32
    %1079 = arith.subf %1077, %1 : f32
    %1080 = arith.mulf %1076, %1079 : f32
    %1081 = arith.mulf %1018, %1078 : f32
    %1082 = arith.subf %1054, %1081 : f32
    %1083 = arith.mulf %1018, %1080 : f32
    %1084 = arith.addf %1060, %1083 : f32
    %1085 = arith.mulf %0, %1082 : f32
    %1086 = arith.mulf %1085, %1084 : f32
    %1087 = arith.subf %1085, %1 : f32
    %1088 = arith.mulf %1084, %1087 : f32
    %1089 = arith.addf %1070, %1078 : f32
    %cst_110 = arith.constant 2.000000e+00 : f32
    %1090 = arith.mulf %cst_110, %1089 : f32
    %1091 = arith.addf %1062, %1090 : f32
    %1092 = arith.addf %1091, %1086 : f32
    %1093 = arith.mulf %1020, %1092 : f32
    %1094 = arith.subf %1054, %1093 : f32
    %1095 = arith.addf %1072, %1080 : f32
    %cst_111 = arith.constant 2.000000e+00 : f32
    %1096 = arith.mulf %cst_111, %1095 : f32
    %1097 = arith.addf %1064, %1096 : f32
    %1098 = arith.addf %1097, %1088 : f32
    %1099 = arith.mulf %1020, %1098 : f32
    %1100 = arith.addf %1060, %1099 : f32
    %1101 = arith.mulf %0, %1094 : f32
    %1102 = arith.mulf %1101, %1100 : f32
    %1103 = arith.subf %1101, %1 : f32
    %1104 = arith.mulf %1100, %1103 : f32
    %1105 = arith.mulf %1019, %1102 : f32
    %1106 = arith.subf %1094, %1105 : f32
    %1107 = arith.mulf %1019, %1104 : f32
    %1108 = arith.addf %1100, %1107 : f32
    %1109 = arith.mulf %0, %1106 : f32
    %1110 = arith.mulf %1109, %1108 : f32
    %1111 = arith.subf %1109, %1 : f32
    %1112 = arith.mulf %1108, %1111 : f32
    %1113 = arith.mulf %1019, %1110 : f32
    %1114 = arith.subf %1094, %1113 : f32
    %1115 = arith.mulf %1019, %1112 : f32
    %1116 = arith.addf %1100, %1115 : f32
    %1117 = arith.mulf %0, %1114 : f32
    %1118 = arith.mulf %1117, %1116 : f32
    %1119 = arith.subf %1117, %1 : f32
    %1120 = arith.mulf %1116, %1119 : f32
    %1121 = arith.mulf %1018, %1118 : f32
    %1122 = arith.subf %1094, %1121 : f32
    %1123 = arith.mulf %1018, %1120 : f32
    %1124 = arith.addf %1100, %1123 : f32
    %1125 = arith.mulf %0, %1122 : f32
    %1126 = arith.mulf %1125, %1124 : f32
    %1127 = arith.subf %1125, %1 : f32
    %1128 = arith.mulf %1124, %1127 : f32
    %1129 = arith.addf %1110, %1118 : f32
    %cst_112 = arith.constant 2.000000e+00 : f32
    %1130 = arith.mulf %cst_112, %1129 : f32
    %1131 = arith.addf %1102, %1130 : f32
    %1132 = arith.addf %1131, %1126 : f32
    %1133 = arith.mulf %1020, %1132 : f32
    %1134 = arith.subf %1094, %1133 : f32
    %1135 = arith.addf %1112, %1120 : f32
    %cst_113 = arith.constant 2.000000e+00 : f32
    %1136 = arith.mulf %cst_113, %1135 : f32
    %1137 = arith.addf %1104, %1136 : f32
    %1138 = arith.addf %1137, %1128 : f32
    %1139 = arith.mulf %1020, %1138 : f32
    %1140 = arith.addf %1100, %1139 : f32
    %1141 = arith.mulf %0, %1134 : f32
    %1142 = arith.mulf %1141, %1140 : f32
    %1143 = arith.subf %1141, %1 : f32
    %1144 = arith.mulf %1140, %1143 : f32
    %1145 = arith.mulf %1019, %1142 : f32
    %1146 = arith.subf %1134, %1145 : f32
    %1147 = arith.mulf %1019, %1144 : f32
    %1148 = arith.addf %1140, %1147 : f32
    %1149 = arith.mulf %0, %1146 : f32
    %1150 = arith.mulf %1149, %1148 : f32
    %1151 = arith.subf %1149, %1 : f32
    %1152 = arith.mulf %1148, %1151 : f32
    %1153 = arith.mulf %1019, %1150 : f32
    %1154 = arith.subf %1134, %1153 : f32
    %1155 = arith.mulf %1019, %1152 : f32
    %1156 = arith.addf %1140, %1155 : f32
    %1157 = arith.mulf %0, %1154 : f32
    %1158 = arith.mulf %1157, %1156 : f32
    %1159 = arith.subf %1157, %1 : f32
    %1160 = arith.mulf %1156, %1159 : f32
    %1161 = arith.mulf %1018, %1158 : f32
    %1162 = arith.subf %1134, %1161 : f32
    %1163 = arith.mulf %1018, %1160 : f32
    %1164 = arith.addf %1140, %1163 : f32
    %1165 = arith.mulf %0, %1162 : f32
    %1166 = arith.mulf %1165, %1164 : f32
    %1167 = arith.subf %1165, %1 : f32
    %1168 = arith.mulf %1164, %1167 : f32
    %1169 = arith.addf %1150, %1158 : f32
    %cst_114 = arith.constant 2.000000e+00 : f32
    %1170 = arith.mulf %cst_114, %1169 : f32
    %1171 = arith.addf %1142, %1170 : f32
    %1172 = arith.addf %1171, %1166 : f32
    %1173 = arith.mulf %1020, %1172 : f32
    %1174 = arith.subf %1134, %1173 : f32
    %1175 = arith.addf %1152, %1160 : f32
    %cst_115 = arith.constant 2.000000e+00 : f32
    %1176 = arith.mulf %cst_115, %1175 : f32
    %1177 = arith.addf %1144, %1176 : f32
    %1178 = arith.addf %1177, %1168 : f32
    %1179 = arith.mulf %1020, %1178 : f32
    %1180 = arith.addf %1140, %1179 : f32
    %c7 = arith.constant 7 : index
    %c0_116 = arith.constant 0 : index
    %1181 = memref.load %arg5[%c7, %c0_116] : memref<8x3xf32, #tpu.memory_space<smem>>
    memref.store %1174, %arg5[%c7, %c0_116] : memref<8x3xf32, #tpu.memory_space<smem>>
    %c7_117 = arith.constant 7 : index
    %c1_118 = arith.constant 1 : index
    %1182 = memref.load %arg5[%c7_117, %c1_118] : memref<8x3xf32, #tpu.memory_space<smem>>
    memref.store %1180, %arg5[%c7_117, %c1_118] : memref<8x3xf32, #tpu.memory_space<smem>>
    %1183 = arith.subf %6, %1174 : f32
    %1184 = arith.subf %1183, %1180 : f32
    %c7_119 = arith.constant 7 : index
    %c2_120 = arith.constant 2 : index
    %1185 = memref.load %arg5[%c7_119, %c2_120] : memref<8x3xf32, #tpu.memory_space<smem>>
    memref.store %1184, %arg5[%c7_119, %c2_120] : memref<8x3xf32, #tpu.memory_space<smem>>
    return
  }
}

</mosaic_0001>

<bundles_post_ra>
// kernel: sir_odeint.1
= control target key start
LH: loop header
LB: loop body
LE: loop exit
PB: predicated region body
PF: predicated region fallthrough
CT: control target
= control target key end

     0   :  { %10 = vsyncpa [#allocation3], 0  ;;  %s2644_s0 = inlined_call_operand.vmem [shape: f32[3], index: 0, kind: input, shape index: {}]   ;;  %s2645_s1 = inlined_call_operand.vmem [shape: f32[7], index: 1, kind: input, shape index: {}]   ;;  %s2646_s2 = inlined_call_operand.vmem [shape: f32[7], index: 2, kind: input, shape index: {}]   ;;  %s2647_s3 = inlined_call_operand.vmem [shape: f32[7], index: 3, kind: input, shape index: {}]   ;;  %s2648_s4 = inlined_call_operand.vmem [shape: f32[2], index: 4, kind: input, shape index: {}]   ;;  %s2649_s5 = inlined_call_operand.vmem [shape: f32[8,3], index: 5, kind: output, shape index: {}]  }
   0x1   :  { %11 = vsyncpa [#allocation6], 0 }
   0x2   :  { %12 = vsyncpa [#allocation9], 0  ;;  %s30_s20 = sshll.u32 %s2645_s1, 4  ;;  %s31_s20 = int_to_ptr.vmem [resolvable:$true] %s30_s20 }
   0x3   :  { %13 = vsyncpa [#allocation4], 0  ;;  %s50_s23 = sshll.u32 %s2647_s3, 4  ;;  %s1335_s24 = scalar_lea.vmem %s31_s20, 16  ;;  %s51_s23 = int_to_ptr.vmem [resolvable:$true] %s50_s23 }
   0x4   :  { %p1336_p0 = scmp.ne.s32.totalorder %s31_s20, %s1335_s24  ;;  %p1340_p1 = scmp.lt.s32.totalorder %s31_s20, %s31_s20 }
   0x5   :  { %p1341_p2 = scmp.lt.s32.totalorder %s1335_s24, %s1335_s24 }
   0x7   :  { %p1342_p3 = por %p1341_p2, %p1340_p1 }
   0x9   :  { %p1343_p4 = pnand %p1342_p3, %p1336_p0 }
   0xb   :  { %1346 = shalt.err (!%p1343_p4)
}
   0xc   :  { %s1415_s25 = smov [#allocation5]   ;;  %s1347_s26 = scalar_lea.vmem %s51_s23, 16 }
   0xd   :  { %33 = dma.vmem_to_smem %s31_s20, 16, %s1415_s25, [#allocation6]  }
   0xe   :  { %p1348_p5 = scmp.ne.s32.totalorder %s51_s23, %s1347_s26  ;;  %p1352_p6 = scmp.lt.s32.totalorder %s51_s23, %s51_s23 }
   0xf   :  { %p1353_p7 = scmp.lt.s32.totalorder %s1347_s26, %s1347_s26 }
  0x11   :  { %p1354_p8 = por %p1353_p7, %p1352_p6 }
  0x13   :  { %p1355_p9 = pnand %p1354_p8, %p1348_p5 }
  0x15   :  { %1358 = shalt.err (!%p1355_p9)
}
  0x16   :  { %s1416_s1 = smov [#allocation8]   ;;  %s20_s28 = sshll.u32 %s2644_s0, 4  ;;  %s21_s28 = int_to_ptr.vmem [resolvable:$true] %s20_s28 }
  0x17   :  { %53 = dma.vmem_to_smem %s51_s23, 16, %s1416_s1, [#allocation9]  }
  0x18   :  { %s40_s6 = sshll.u32 %s2646_s2, 4  ;;  %s1359_s7 = scalar_lea.vmem %s21_s28, 16  ;;  %s41_s6 = int_to_ptr.vmem [resolvable:$true] %s40_s6 }
  0x19   :  { %p1360_p10 = scmp.ne.s32.totalorder %s21_s28, %s1359_s7  ;;  %p1364_p11 = scmp.lt.s32.totalorder %s21_s28, %s21_s28 }
  0x1a   :  { %p1365_p12 = scmp.lt.s32.totalorder %s1359_s7, %s1359_s7 }
  0x1c   :  { %p1366_p13 = por %p1365_p12, %p1364_p11 }
  0x1e   :  { %p1367_p0 = pnand %p1366_p13, %p1360_p10 }
  0x20   :  { %1370 = shalt.err (!%p1367_p0)
}
  0x21   :  { %s1417_s8 = smov [#allocation2]   ;;  %s1371_s9 = scalar_lea.vmem %s41_s6, 16 }
  0x22   :  { %23 = dma.vmem_to_smem %s21_s28, 16, %s1417_s8, [#allocation3]  }
  0x23   :  { %p1372_p1 = scmp.ne.s32.totalorder %s41_s6, %s1371_s9  ;;  %p1376_p2 = scmp.lt.s32.totalorder %s41_s6, %s41_s6 }
  0x24   :  { %p1377_p3 = scmp.lt.s32.totalorder %s1371_s9, %s1371_s9 }
  0x26   :  { %p1378_p4 = por %p1377_p3, %p1376_p2 }
  0x28   :  { %p1379_p5 = pnand %p1378_p4, %p1372_p1 }
  0x2a   :  { %1382 = shalt.err (!%p1379_p5)
}
  0x2b   :  { %s1418_s0 = smov [#allocation7]   ;;  %s60_s11 = sshll.u32 %s2648_s4, 4  ;;  %s61_s11 = int_to_ptr.vmem [resolvable:$true] %s60_s11 }
  0x2c   :  { %43 = dma.vmem_to_smem %s41_s6, 16, %s1418_s0, [#allocation6]  }
  0x2d   :  { %s1383_s12 = scalar_lea.vmem %s61_s11, 16  ;;  %p1388_p7 = scmp.lt.s32.totalorder %s61_s11, %s61_s11 }
  0x2e   :  { %p1384_p6 = scmp.ne.s32.totalorder %s61_s11, %s1383_s12  ;;  %p1389_p8 = scmp.lt.s32.totalorder %s1383_s12, %s1383_s12 }
  0x30   :  { %p1390_p9 = por %p1389_p8, %p1388_p7 }
  0x32   :  { %p1391_p10 = pnand %p1390_p9, %p1384_p6 }
  0x34   :  { %1394 = shalt.err (!%p1391_p10)
}
  0x35   :  { %s1419_s13 = smov [#allocation10]  }
  0x36   :  { %63 = dma.vmem_to_smem %s61_s11, 16, %s1419_s13, [#allocation9]  }
  0x37   :  { %1407 = dma.done.wait [#allocation3], 16  }
  0x38   :  { %1408 = vsyncadd [#allocation3], 4294967280 }
  0x39   :  { %1409 = dma.done.wait [#allocation6], 32  }
  0x3a   :  { %1410 = vsyncadd [#allocation6], 4294967264 }
  0x3b   :  { %1411 = dma.done.wait [#allocation9], 32  }
  0x3c   :  { %1412 = vsyncadd [#allocation9], 4294967264 }
  0x3d   :  { %79 = sfence }
  0x3e   :  { %s1466_s14 = sld [smem:[#allocation10]] }
  0x3f   :  { %s1468_s4 = sld [smem:[#allocation2]] }
  0x40   :  { %s1470_s15 = sld [smem:[#allocation2 + $0x1]] }
  0x41   :  { %s1310_s16 = sld [smem:[#allocation2 + $0x2]] }
  0x42   :  { %s1472_s17 = sld [smem:[#allocation10 + $0x1]] }
  0x43   :  { %s1474_s18 = sld [smem:[#allocation7]] }
  0x44   :  { %s1500_s7 = sld [smem:[#allocation5]] }
  0x45   :  { %88 = sst [smem:[#allocation11]] %s1468_s4  ;;  %s96_s19 = smul.f32 %s1468_s4, %s1466_s14 }
  0x46   :  { %s85_s20 = sadd.f32 %s1470_s15, %s1468_s4 }
  0x47   :  { %90 = sst [smem:[#allocation11 + $0x1]] %s1470_s15  ;;  %s1483_s21 = smul.f32 %s1470_s15, %s96_s19 }
  0x48   :  { %s1485_s22 = sadd.f32 %s1310_s16, %s85_s20 }
  0x49   :  { %92 = sst [smem:[#allocation11 + $0x2]] %s1310_s16  ;;  %s100_s23 = smul.f32 %s1483_s21, %s1474_s18 }
  0x4a   :  { %s98_s24 = ssub.f32 %s96_s19, %s1472_s17 }
  0x4b   :  { %s101_s25 = ssub.f32 %s1468_s4, %s100_s23 }
  0x4c   :  { %s1492_s26 = smul.f32 %s1470_s15, %s98_s24  ;;  %s1507_s16 = sld [smem:[#allocation8]] }
  0x4d   :  { %s104_s1 = smul.f32 %s101_s25, %s1466_s14 }
  0x4e   :  { %s102_s3 = smul.f32 %s1492_s26, %s1474_s18 }
  0x4f   :  { %s106_s27 = ssub.f32 %s104_s1, %s1472_s17 }
  0x50   :  { %s103_s28 = sadd.f32 %s1470_s15, %s102_s3 }
  0x52   :  { %s105_s29 = smul.f32 %s104_s1, %s103_s28 }
  0x53   :  { %s107_s30 = smul.f32 %s106_s27, %s103_s28 }
  0x54   :  { %s108_s6 = smul.f32 %s105_s29, %s1474_s18 }
  0x55   :  { %s110_s8 = smul.f32 %s107_s30, %s1474_s18 }
  0x56   :  { %s109_s9 = ssub.f32 %s1468_s4, %s108_s6 }
  0x57   :  { %s111_s0 = sadd.f32 %s1470_s15, %s110_s8 }
  0x58   :  { %s112_s2 = smul.f32 %s109_s9, %s1466_s14 }
  0x5a   :  { %s113_s10 = smul.f32 %s112_s2, %s111_s0  ;;  %s114_s11 = ssub.f32 %s112_s2, %s1472_s17 }
  0x5c   :  { %s115_s12 = smul.f32 %s114_s11, %s111_s0  ;;  %s124_s13 = sadd.f32 %s113_s10, %s105_s29 }
  0x5d   :  { %s116_s19 = smul.f32 %s113_s10, %s1500_s7 }
  0x5e   :  { %s118_s20 = smul.f32 %s115_s12, %s1500_s7  ;;  %s130_s23 = sadd.f32 %s115_s12, %s107_s30 }
  0x5f   :  { %s117_s24 = ssub.f32 %s1468_s4, %s116_s19  ;;  %s125_s25 = smul.f32 2.0, %s124_s13 }
  0x60   :  { %s119_s1 = sadd.f32 %s1470_s15, %s118_s20  ;;  %s131_s3 = smul.f32 2.0, %s130_s23 }
  0x61   :  { %s120_s27 = smul.f32 %s117_s24, %s1466_s14  ;;  %s126_s28 = sadd.f32 %s125_s25, %s1483_s21 }
  0x62   :  { %s132_s29 = sadd.f32 %s131_s3, %s1492_s26 }
  0x63   :  { %s121_s6 = smul.f32 %s120_s27, %s119_s1  ;;  %s122_s8 = ssub.f32 %s120_s27, %s1472_s17 }
  0x65   :  { %s123_s9 = smul.f32 %s122_s8, %s119_s1  ;;  %s127_s0 = sadd.f32 %s126_s28, %s121_s6 }
  0x67   :  { %s128_s2 = smul.f32 %s127_s0, %s1507_s16  ;;  %s133_s30 = sadd.f32 %s132_s29, %s123_s9 }
  0x69   :  { %s1519_s10 = ssub.f32 %s1468_s4, %s128_s2  ;;  %s134_s11 = smul.f32 %s133_s30, %s1507_s16 }
  0x6b   :  { %s1523_s12 = sadd.f32 %s1470_s15, %s134_s11  ;;  %s136_s21 = smul.f32 %s1519_s10, %s1466_s14 }
  0x6d   :  { %s1528_s26 = smul.f32 %s136_s21, %s1523_s12  ;;  %s138_s13 = ssub.f32 %s136_s21, %s1472_s17 }
  0x6f   :  { %s1532_s4 = smul.f32 %s138_s13, %s1523_s12 }
  0x70   :  { %s140_s19 = smul.f32 %s1528_s26, %s1474_s18 }
  0x71   :  { %s142_s20 = smul.f32 %s1532_s4, %s1474_s18 }
  0x72   :  { %s141_s23 = ssub.f32 %s1519_s10, %s140_s19 }
  0x73   :  { %s143_s15 = sadd.f32 %s142_s20, %s1523_s12 }
  0x74   :  { %s144_s24 = smul.f32 %s141_s23, %s1466_s14 }
  0x76   :  { %s145_s25 = smul.f32 %s144_s24, %s143_s15  ;;  %s146_s1 = ssub.f32 %s144_s24, %s1472_s17 }
  0x78   :  { %s147_s3 = smul.f32 %s146_s1, %s143_s15 }
  0x79   :  { %s148_s27 = smul.f32 %s145_s25, %s1474_s18 }
  0x7a   :  { %s150_s28 = smul.f32 %s147_s3, %s1474_s18 }
  0x7b   :  { %s149_s29 = ssub.f32 %s1519_s10, %s148_s27 }
  0x7c   :  { %s151_s6 = sadd.f32 %s150_s28, %s1523_s12 }
  0x7d   :  { %s152_s8 = smul.f32 %s149_s29, %s1466_s14 }
  0x7f   :  { %s153_s9 = smul.f32 %s152_s8, %s151_s6  ;;  %s154_s0 = ssub.f32 %s152_s8, %s1472_s17 }
  0x81   :  { %s155_s2 = smul.f32 %s154_s0, %s151_s6  ;;  %s164_s30 = sadd.f32 %s153_s9, %s145_s25 }
  0x82   :  { %s156_s11 = smul.f32 %s153_s9, %s1500_s7 }
  0x83   :  { %s158_s21 = smul.f32 %s155_s2, %s1500_s7  ;;  %s170_s13 = sadd.f32 %s155_s2, %s147_s3 }
  0x84   :  { %s157_s19 = ssub.f32 %s1519_s10, %s156_s11  ;;  %s165_s20 = smul.f32 2.0, %s164_s30 }
  0x85   :  { %s159_s23 = sadd.f32 %s158_s21, %s1523_s12  ;;  %s171_s15 = smul.f32 2.0, %s170_s13 }
  0x86   :  { %s160_s24 = smul.f32 %s157_s19, %s1466_s14  ;;  %s166_s1 = sadd.f32 %s165_s20, %s1528_s26 }
  0x87   :  { %s172_s27 = sadd.f32 %s171_s15, %s1532_s4 }
  0x88   :  { %s161_s28 = smul.f32 %s160_s24, %s159_s23  ;;  %s162_s29 = ssub.f32 %s160_s24, %s1472_s17 }
  0x8a   :  { %s163_s25 = smul.f32 %s162_s29, %s159_s23  ;;  %s167_s6 = sadd.f32 %s166_s1, %s161_s28 }
  0x8c   :  { %s168_s8 = smul.f32 %s167_s6, %s1507_s16  ;;  %s173_s3 = sadd.f32 %s172_s27, %s163_s25 }
  0x8e   :  { %s1558_s9 = ssub.f32 %s1519_s10, %s168_s8  ;;  %s174_s0 = smul.f32 %s173_s3, %s1507_s16 }
  0x90   :  { %s1562_s2 = sadd.f32 %s174_s0, %s1523_s12  ;;  %s176_s26 = smul.f32 %s1558_s9, %s1466_s14 }
  0x92   :  { %s1567_s4 = smul.f32 %s176_s26, %s1562_s2  ;;  %s178_s30 = ssub.f32 %s176_s26, %s1472_s17 }
  0x94   :  { %s1571_s10 = smul.f32 %s178_s30, %s1562_s2 }
  0x95   :  { %s180_s11 = smul.f32 %s1567_s4, %s1474_s18 }
  0x96   :  { %s182_s21 = smul.f32 %s1571_s10, %s1474_s18 }
  0x97   :  { %s181_s13 = ssub.f32 %s1558_s9, %s180_s11 }
  0x98   :  { %s183_s12 = sadd.f32 %s182_s21, %s1562_s2 }
  0x99   :  { %s184_s19 = smul.f32 %s181_s13, %s1466_s14 }
  0x9b   :  { %s185_s20 = smul.f32 %s184_s19, %s183_s12  ;;  %s186_s23 = ssub.f32 %s184_s19, %s1472_s17 }
  0x9d   :  { %s187_s15 = smul.f32 %s186_s23, %s183_s12 }
  0x9e   :  { %s188_s24 = smul.f32 %s185_s20, %s1474_s18 }
  0x9f   :  { %s190_s1 = smul.f32 %s187_s15, %s1474_s18 }
  0xa0   :  { %s189_s27 = ssub.f32 %s1558_s9, %s188_s24 }
  0xa1   :  { %s191_s28 = sadd.f32 %s190_s1, %s1562_s2 }
  0xa2   :  { %s192_s29 = smul.f32 %s189_s27, %s1466_s14 }
  0xa4   :  { %s193_s25 = smul.f32 %s192_s29, %s191_s28  ;;  %s194_s6 = ssub.f32 %s192_s29, %s1472_s17 }
  0xa6   :  { %s195_s8 = smul.f32 %s194_s6, %s191_s28  ;;  %s204_s3 = sadd.f32 %s193_s25, %s185_s20 }
  0xa7   :  { %s196_s0 = smul.f32 %s193_s25, %s1500_s7 }
  0xa8   :  { %s198_s26 = smul.f32 %s195_s8, %s1500_s7  ;;  %s210_s30 = sadd.f32 %s195_s8, %s187_s15 }
  0xa9   :  { %s197_s11 = ssub.f32 %s1558_s9, %s196_s0  ;;  %s205_s21 = smul.f32 2.0, %s204_s3 }
  0xaa   :  { %s199_s13 = sadd.f32 %s198_s26, %s1562_s2  ;;  %s211_s12 = smul.f32 2.0, %s210_s30 }
  0xab   :  { %s200_s19 = smul.f32 %s197_s11, %s1466_s14  ;;  %s206_s23 = sadd.f32 %s205_s21, %s1567_s4 }
  0xac   :  { %s212_s24 = sadd.f32 %s211_s12, %s1571_s10 }
  0xad   :  { %s201_s1 = smul.f32 %s200_s19, %s199_s13  ;;  %s202_s27 = ssub.f32 %s200_s19, %s1472_s17 }
  0xaf   :  { %s203_s20 = smul.f32 %s202_s27, %s199_s13  ;;  %s207_s28 = sadd.f32 %s206_s23, %s201_s1 }
  0xb1   :  { %s208_s29 = smul.f32 %s207_s28, %s1507_s16  ;;  %s213_s15 = sadd.f32 %s212_s24, %s203_s20 }
  0xb3   :  { %s1597_s25 = ssub.f32 %s1558_s9, %s208_s29  ;;  %s214_s6 = smul.f32 %s213_s15, %s1507_s16 }
  0xb5   :  { %s1601_s8 = sadd.f32 %s214_s6, %s1562_s2  ;;  %s216_s4 = smul.f32 %s1597_s25, %s1466_s14 }
  0xb7   :  { %s1606_s10 = smul.f32 %s216_s4, %s1601_s8  ;;  %s218_s3 = ssub.f32 %s216_s4, %s1472_s17 }
  0xb9   :  { %s1610_s9 = smul.f32 %s218_s3, %s1601_s8 }
  0xba   :  { %s220_s0 = smul.f32 %s1606_s10, %s1474_s18 }
  0xbb   :  { %s222_s26 = smul.f32 %s1610_s9, %s1474_s18 }
  0xbc   :  { %s221_s30 = ssub.f32 %s1597_s25, %s220_s0 }
  0xbd   :  { %s223_s2 = sadd.f32 %s222_s26, %s1601_s8 }
  0xbe   :  { %s224_s11 = smul.f32 %s221_s30, %s1466_s14 }
  0xc0   :  { %s225_s21 = smul.f32 %s224_s11, %s223_s2  ;;  %s226_s13 = ssub.f32 %s224_s11, %s1472_s17 }
  0xc2   :  { %s227_s12 = smul.f32 %s226_s13, %s223_s2 }
  0xc3   :  { %s228_s19 = smul.f32 %s225_s21, %s1474_s18 }
  0xc4   :  { %s230_s23 = smul.f32 %s227_s12, %s1474_s18 }
  0xc5   :  { %s229_s24 = ssub.f32 %s1597_s25, %s228_s19 }
  0xc6   :  { %s231_s1 = sadd.f32 %s230_s23, %s1601_s8 }
  0xc7   :  { %s232_s27 = smul.f32 %s229_s24, %s1466_s14 }
  0xc9   :  { %s233_s20 = smul.f32 %s232_s27, %s231_s1  ;;  %s234_s28 = ssub.f32 %s232_s27, %s1472_s17 }
  0xcb   :  { %s235_s29 = smul.f32 %s234_s28, %s231_s1  ;;  %s244_s15 = sadd.f32 %s233_s20, %s225_s21 }
  0xcc   :  { %s236_s6 = smul.f32 %s233_s20, %s1500_s7  ;;  %s1634_s1 = sld [smem:[#allocation7 + $0x1]] }
  0xcd   :  { %s238_s4 = smul.f32 %s235_s29, %s1500_s7  ;;  %s250_s3 = sadd.f32 %s235_s29, %s227_s12 }
  0xce   :  { %s237_s0 = ssub.f32 %s1597_s25, %s236_s6  ;;  %s245_s26 = smul.f32 2.0, %s244_s15 }
  0xcf   :  { %s239_s18 = sadd.f32 %s238_s4, %s1601_s8  ;;  %s251_s30 = smul.f32 2.0, %s250_s3 }
  0xd0   :  { %s240_s2 = smul.f32 %s237_s0, %s1466_s14  ;;  %s246_s11 = sadd.f32 %s245_s26, %s1606_s10 }
  0xd1   :  { %s252_s13 = sadd.f32 %s251_s30, %s1610_s9 }
  0xd2   :  { %s241_s19 = smul.f32 %s240_s2, %s239_s18  ;;  %s242_s23 = ssub.f32 %s240_s2, %s1472_s17 }
  0xd4   :  { %s243_s21 = smul.f32 %s242_s23, %s239_s18  ;;  %s247_s24 = sadd.f32 %s246_s11, %s241_s19 }
  0xd5   :  { %s1667_s11 = sld [smem:[#allocation5 + $0x1]] }
  0xd6   :  { %s248_s7 = smul.f32 %s247_s24, %s1507_s16  ;;  %s253_s12 = sadd.f32 %s252_s13, %s243_s21 }
  0xd8   :  { %s1638_s27 = ssub.f32 %s1597_s25, %s248_s7  ;;  %s254_s10 = smul.f32 %s253_s12, %s1507_s16 }
  0xda   :  { %s1642_s9 = sadd.f32 %s254_s10, %s1601_s8  ;;  %s267_s20 = smul.f32 %s1638_s27, %s1466_s14 }
  0xdb   :  { %257 = sst [smem:[#allocation11 + $0x80]] %s1638_s27 }
  0xdc   :  { %259 = sst [smem:[#allocation11 + $0x81]] %s1642_s9  ;;  %s1649_s28 = smul.f32 %s267_s20, %s1642_s9 }
  0xdd   :  { %s260_s25 = ssub.f32 %s1485_s22, %s1638_s27 }
  0xde   :  { %s269_s29 = ssub.f32 %s267_s20, %s1472_s17  ;;  %s271_s16 = smul.f32 %s1634_s1, %s1649_s28 }
  0xdf   :  { %s261_s8 = ssub.f32 %s260_s25, %s1642_s9 }
  0xe0   :  { %s1658_s15 = smul.f32 %s269_s29, %s1642_s9  ;;  %s272_s6 = ssub.f32 %s1638_s27, %s271_s16 }
  0xe1   :  { %263 = sst [smem:[#allocation11 + $0x82]] %s261_s8 }
  0xe2   :  { %s273_s4 = smul.f32 %s1634_s1, %s1658_s15  ;;  %s1674_s20 = sld [smem:[#allocation8 + $0x1]] }
  0xe3   :  { %s275_s3 = smul.f32 %s272_s6, %s1466_s14 }
  0xe4   :  { %s274_s0 = sadd.f32 %s273_s4, %s1642_s9 }
  0xe5   :  { %s277_s26 = ssub.f32 %s275_s3, %s1472_s17 }
  0xe6   :  { %s276_s18 = smul.f32 %s275_s3, %s274_s0 }
  0xe7   :  { %s278_s30 = smul.f32 %s277_s26, %s274_s0 }
  0xe8   :  { %s279_s2 = smul.f32 %s1634_s1, %s276_s18 }
  0xe9   :  { %s281_s13 = smul.f32 %s1634_s1, %s278_s30 }
  0xea   :  { %s280_s19 = ssub.f32 %s1638_s27, %s279_s2 }
  0xeb   :  { %s282_s23 = sadd.f32 %s281_s13, %s1642_s9 }
  0xec   :  { %s283_s21 = smul.f32 %s280_s19, %s1466_s14 }
  0xee   :  { %s284_s24 = smul.f32 %s283_s21, %s282_s23  ;;  %s285_s7 = ssub.f32 %s283_s21, %s1472_s17 }
  0xf0   :  { %s286_s12 = smul.f32 %s285_s7, %s282_s23  ;;  %s295_s10 = sadd.f32 %s284_s24, %s276_s18 }
  0xf1   :  { %s287_s25 = smul.f32 %s1667_s11, %s284_s24 }
  0xf2   :  { %s289_s29 = smul.f32 %s1667_s11, %s286_s12  ;;  %s301_s16 = sadd.f32 %s286_s12, %s278_s30 }
  0xf3   :  { %s288_s8 = ssub.f32 %s1638_s27, %s287_s25  ;;  %s296_s6 = smul.f32 2.0, %s295_s10 }
  0xf4   :  { %s290_s4 = sadd.f32 %s289_s29, %s1642_s9  ;;  %s302_s3 = smul.f32 2.0, %s301_s16 }
  0xf5   :  { %s291_s0 = smul.f32 %s288_s8, %s1466_s14  ;;  %s297_s26 = sadd.f32 %s296_s6, %s1649_s28 }
  0xf6   :  { %s303_s18 = sadd.f32 %s302_s3, %s1658_s15 }
  0xf7   :  { %s292_s2 = smul.f32 %s291_s0, %s290_s4  ;;  %s293_s13 = ssub.f32 %s291_s0, %s1472_s17 }
  0xf9   :  { %s294_s19 = smul.f32 %s293_s13, %s290_s4  ;;  %s298_s23 = sadd.f32 %s297_s26, %s292_s2 }
  0xfb   :  { %s299_s21 = smul.f32 %s1674_s20, %s298_s23  ;;  %s304_s30 = sadd.f32 %s303_s18, %s294_s19 }
  0xfd   :  { %s1686_s24 = ssub.f32 %s1638_s27, %s299_s21  ;;  %s305_s7 = smul.f32 %s1674_s20, %s304_s30 }
  0xff   :  { %s1690_s12 = sadd.f32 %s305_s7, %s1642_s9  ;;  %s307_s28 = smul.f32 %s1686_s24, %s1466_s14 }
 0x101   :  { %s1695_s15 = smul.f32 %s307_s28, %s1690_s12  ;;  %s309_s10 = ssub.f32 %s307_s28, %s1472_s17 }
 0x103   :  { %s1699_s27 = smul.f32 %s309_s10, %s1690_s12 }
 0x104   :  { %s311_s25 = smul.f32 %s1634_s1, %s1695_s15 }
 0x105   :  { %s313_s29 = smul.f32 %s1634_s1, %s1699_s27 }
 0x106   :  { %s312_s16 = ssub.f32 %s1686_s24, %s311_s25 }
 0x107   :  { %s314_s9 = sadd.f32 %s313_s29, %s1690_s12 }
 0x108   :  { %s315_s8 = smul.f32 %s312_s16, %s1466_s14 }
 0x10a   :  { %s316_s6 = smul.f32 %s315_s8, %s314_s9  ;;  %s317_s4 = ssub.f32 %s315_s8, %s1472_s17 }
 0x10c   :  { %s318_s3 = smul.f32 %s317_s4, %s314_s9 }
 0x10d   :  { %s319_s0 = smul.f32 %s1634_s1, %s316_s6 }
 0x10e   :  { %s321_s26 = smul.f32 %s1634_s1, %s318_s3 }
 0x10f   :  { %s320_s18 = ssub.f32 %s1686_s24, %s319_s0 }
 0x110   :  { %s322_s2 = sadd.f32 %s321_s26, %s1690_s12 }
 0x111   :  { %s323_s13 = smul.f32 %s320_s18, %s1466_s14 }
 0x113   :  { %s324_s19 = smul.f32 %s323_s13, %s322_s2  ;;  %s325_s23 = ssub.f32 %s323_s13, %s1472_s17 }
 0x115   :  { %s326_s21 = smul.f32 %s325_s23, %s322_s2  ;;  %s335_s30 = sadd.f32 %s324_s19, %s316_s6 }
 0x116   :  { %s327_s7 = smul.f32 %s1667_s11, %s324_s19 }
 0x117   :  { %s329_s28 = smul.f32 %s1667_s11, %s326_s21  ;;  %s341_s10 = sadd.f32 %s326_s21, %s318_s3 }
 0x118   :  { %s328_s25 = ssub.f32 %s1686_s24, %s327_s7  ;;  %s336_s29 = smul.f32 2.0, %s335_s30 }
 0x119   :  { %s330_s16 = sadd.f32 %s329_s28, %s1690_s12  ;;  %s342_s9 = smul.f32 2.0, %s341_s10 }
 0x11a   :  { %s331_s8 = smul.f32 %s328_s25, %s1466_s14  ;;  %s337_s4 = sadd.f32 %s336_s29, %s1695_s15 }
 0x11b   :  { %s343_s0 = sadd.f32 %s342_s9, %s1699_s27 }
 0x11c   :  { %s332_s26 = smul.f32 %s331_s8, %s330_s16  ;;  %s333_s18 = ssub.f32 %s331_s8, %s1472_s17 }
 0x11e   :  { %s334_s6 = smul.f32 %s333_s18, %s330_s16  ;;  %s338_s2 = sadd.f32 %s337_s4, %s332_s26 }
 0x120   :  { %s339_s13 = smul.f32 %s1674_s20, %s338_s2  ;;  %s344_s3 = sadd.f32 %s343_s0, %s334_s6 }
 0x122   :  { %s1725_s19 = ssub.f32 %s1686_s24, %s339_s13  ;;  %s345_s23 = smul.f32 %s1674_s20, %s344_s3 }
 0x124   :  { %s1729_s21 = sadd.f32 %s345_s23, %s1690_s12  ;;  %s347_s15 = smul.f32 %s1725_s19, %s1466_s14 }
 0x126   :  { %s1734_s27 = smul.f32 %s347_s15, %s1729_s21  ;;  %s349_s30 = ssub.f32 %s347_s15, %s1472_s17 }
 0x128   :  { %s1738_s24 = smul.f32 %s349_s30, %s1729_s21 }
 0x129   :  { %s351_s7 = smul.f32 %s1634_s1, %s1734_s27 }
 0x12a   :  { %s353_s28 = smul.f32 %s1634_s1, %s1738_s24 }
 0x12b   :  { %s352_s10 = ssub.f32 %s1725_s19, %s351_s7 }
 0x12c   :  { %s354_s12 = sadd.f32 %s353_s28, %s1729_s21 }
 0x12d   :  { %s355_s25 = smul.f32 %s352_s10, %s1466_s14 }
 0x12f   :  { %s356_s29 = smul.f32 %s355_s25, %s354_s12  ;;  %s357_s16 = ssub.f32 %s355_s25, %s1472_s17 }
 0x131   :  { %s358_s9 = smul.f32 %s357_s16, %s354_s12 }
 0x132   :  { %s359_s8 = smul.f32 %s1634_s1, %s356_s29 }
 0x133   :  { %s361_s4 = smul.f32 %s1634_s1, %s358_s9 }
 0x134   :  { %s360_s0 = ssub.f32 %s1725_s19, %s359_s8 }
 0x135   :  { %s362_s26 = sadd.f32 %s361_s4, %s1729_s21 }
 0x136   :  { %s363_s18 = smul.f32 %s360_s0, %s1466_s14 }
 0x138   :  { %s364_s6 = smul.f32 %s363_s18, %s362_s26  ;;  %s365_s2 = ssub.f32 %s363_s18, %s1472_s17 }
 0x13a   :  { %s366_s13 = smul.f32 %s365_s2, %s362_s26  ;;  %s375_s3 = sadd.f32 %s364_s6, %s356_s29 }
 0x13b   :  { %s367_s23 = smul.f32 %s1667_s11, %s364_s6 }
 0x13c   :  { %s369_s15 = smul.f32 %s1667_s11, %s366_s13  ;;  %s381_s30 = sadd.f32 %s366_s13, %s358_s9 }
 0x13d   :  { %s368_s7 = ssub.f32 %s1725_s19, %s367_s23  ;;  %s376_s28 = smul.f32 2.0, %s375_s3 }
 0x13e   :  { %s370_s10 = sadd.f32 %s369_s15, %s1729_s21  ;;  %s382_s12 = smul.f32 2.0, %s381_s30 }
 0x13f   :  { %s371_s25 = smul.f32 %s368_s7, %s1466_s14  ;;  %s377_s16 = sadd.f32 %s376_s28, %s1734_s27 }
 0x140   :  { %s383_s8 = sadd.f32 %s382_s12, %s1738_s24 }
 0x141   :  { %s372_s4 = smul.f32 %s371_s25, %s370_s10  ;;  %s373_s0 = ssub.f32 %s371_s25, %s1472_s17 }
 0x143   :  { %s374_s29 = smul.f32 %s373_s0, %s370_s10  ;;  %s378_s26 = sadd.f32 %s377_s16, %s372_s4 }
 0x145   :  { %s379_s18 = smul.f32 %s1674_s20, %s378_s26  ;;  %s384_s9 = sadd.f32 %s383_s8, %s374_s29 }
 0x147   :  { %s1764_s6 = ssub.f32 %s1725_s19, %s379_s18  ;;  %s385_s2 = smul.f32 %s1674_s20, %s384_s9 }
 0x149   :  { %s1768_s13 = sadd.f32 %s385_s2, %s1729_s21  ;;  %s387_s27 = smul.f32 %s1764_s6, %s1466_s14 }
 0x14b   :  { %s1773_s24 = smul.f32 %s387_s27, %s1768_s13  ;;  %s389_s3 = ssub.f32 %s387_s27, %s1472_s17 }
 0x14d   :  { %s1777_s19 = smul.f32 %s389_s3, %s1768_s13 }
 0x14e   :  { %s391_s23 = smul.f32 %s1634_s1, %s1773_s24 }
 0x14f   :  { %s393_s15 = smul.f32 %s1634_s1, %s1777_s19 }
 0x150   :  { %s392_s30 = ssub.f32 %s1764_s6, %s391_s23 }
 0x151   :  { %s394_s21 = sadd.f32 %s393_s15, %s1768_s13 }
 0x152   :  { %s395_s7 = smul.f32 %s392_s30, %s1466_s14 }
 0x154   :  { %s396_s28 = smul.f32 %s395_s7, %s394_s21  ;;  %s397_s10 = ssub.f32 %s395_s7, %s1472_s17 }
 0x156   :  { %s398_s12 = smul.f32 %s397_s10, %s394_s21 }
 0x157   :  { %s399_s25 = smul.f32 %s1634_s1, %s396_s28 }
 0x158   :  { %s401_s16 = smul.f32 %s1634_s1, %s398_s12 }
 0x159   :  { %s400_s8 = ssub.f32 %s1764_s6, %s399_s25 }
 0x15a   :  { %s402_s4 = sadd.f32 %s401_s16, %s1768_s13 }
 0x15b   :  { %s403_s0 = smul.f32 %s400_s8, %s1466_s14 }
 0x15d   :  { %s404_s29 = smul.f32 %s403_s0, %s402_s4  ;;  %s405_s26 = ssub.f32 %s403_s0, %s1472_s17 }
 0x15f   :  { %s406_s18 = smul.f32 %s405_s26, %s402_s4  ;;  %s415_s9 = sadd.f32 %s404_s29, %s396_s28 }
 0x160   :  { %s407_s2 = smul.f32 %s1667_s11, %s404_s29  ;;  %s1801_s4 = sld [smem:[#allocation7 + $0x2]] }
 0x161   :  { %s409_s27 = smul.f32 %s1667_s11, %s406_s18  ;;  %s421_s3 = sadd.f32 %s406_s18, %s398_s12 }
 0x162   :  { %s408_s23 = ssub.f32 %s1764_s6, %s407_s2  ;;  %s416_s15 = smul.f32 2.0, %s415_s9 }
 0x163   :  { %s410_s1 = sadd.f32 %s409_s27, %s1768_s13  ;;  %s422_s30 = smul.f32 2.0, %s421_s3 }
 0x164   :  { %s411_s21 = smul.f32 %s408_s23, %s1466_s14  ;;  %s417_s7 = sadd.f32 %s416_s15, %s1773_s24 }
 0x165   :  { %s423_s10 = sadd.f32 %s422_s30, %s1777_s19 }
 0x166   :  { %s412_s25 = smul.f32 %s411_s21, %s410_s1  ;;  %s413_s16 = ssub.f32 %s411_s21, %s1472_s17 }
 0x168   :  { %s414_s28 = smul.f32 %s413_s16, %s410_s1  ;;  %s418_s8 = sadd.f32 %s417_s7, %s412_s25 }
 0x169   :  { %s1834_s7 = sld [smem:[#allocation5 + $0x2]] }
 0x16a   :  { %s419_s11 = smul.f32 %s1674_s20, %s418_s8  ;;  %s424_s12 = sadd.f32 %s423_s10, %s414_s28 }
 0x16c   :  { %s1805_s0 = ssub.f32 %s1764_s6, %s419_s11  ;;  %s425_s24 = smul.f32 %s1674_s20, %s424_s12 }
 0x16e   :  { %s1809_s19 = sadd.f32 %s425_s24, %s1768_s13  ;;  %s438_s29 = smul.f32 %s1805_s0, %s1466_s14 }
 0x16f   :  { %428 = sst [smem:[#allocation11 + $0x100]] %s1805_s0 }
 0x170   :  { %430 = sst [smem:[#allocation11 + $0x101]] %s1809_s19  ;;  %s1816_s26 = smul.f32 %s438_s29, %s1809_s19 }
 0x171   :  { %s431_s6 = ssub.f32 %s1485_s22, %s1805_s0 }
 0x172   :  { %s440_s18 = ssub.f32 %s438_s29, %s1472_s17  ;;  %s442_s20 = smul.f32 %s1801_s4, %s1816_s26 }
 0x173   :  { %s432_s13 = ssub.f32 %s431_s6, %s1809_s19 }
 0x174   :  { %s1825_s9 = smul.f32 %s440_s18, %s1809_s19  ;;  %s443_s2 = ssub.f32 %s1805_s0, %s442_s20 }
 0x175   :  { %434 = sst [smem:[#allocation11 + $0x102]] %s432_s13 }
 0x176   :  { %s444_s27 = smul.f32 %s1801_s4, %s1825_s9  ;;  %s1841_s29 = sld [smem:[#allocation8 + $0x2]] }
 0x177   :  { %s446_s3 = smul.f32 %s443_s2, %s1466_s14 }
 0x178   :  { %s445_s23 = sadd.f32 %s444_s27, %s1809_s19 }
 0x179   :  { %s448_s15 = ssub.f32 %s446_s3, %s1472_s17 }
 0x17a   :  { %s447_s1 = smul.f32 %s446_s3, %s445_s23 }
 0x17b   :  { %s449_s30 = smul.f32 %s448_s15, %s445_s23 }
 0x17c   :  { %s450_s21 = smul.f32 %s1801_s4, %s447_s1 }
 0x17d   :  { %s452_s10 = smul.f32 %s1801_s4, %s449_s30 }
 0x17e   :  { %s451_s25 = ssub.f32 %s1805_s0, %s450_s21 }
 0x17f   :  { %s453_s16 = sadd.f32 %s452_s10, %s1809_s19 }
 0x180   :  { %s454_s28 = smul.f32 %s451_s25, %s1466_s14 }
 0x182   :  { %s455_s8 = smul.f32 %s454_s28, %s453_s16  ;;  %s456_s11 = ssub.f32 %s454_s28, %s1472_s17 }
 0x184   :  { %s457_s12 = smul.f32 %s456_s11, %s453_s16  ;;  %s466_s24 = sadd.f32 %s455_s8, %s447_s1 }
 0x185   :  { %s458_s6 = smul.f32 %s1834_s7, %s455_s8 }
 0x186   :  { %s460_s18 = smul.f32 %s1834_s7, %s457_s12  ;;  %s472_s20 = sadd.f32 %s457_s12, %s449_s30 }
 0x187   :  { %s459_s13 = ssub.f32 %s1805_s0, %s458_s6  ;;  %s467_s2 = smul.f32 2.0, %s466_s24 }
 0x188   :  { %s461_s27 = sadd.f32 %s460_s18, %s1809_s19  ;;  %s473_s3 = smul.f32 2.0, %s472_s20 }
 0x189   :  { %s462_s23 = smul.f32 %s459_s13, %s1466_s14  ;;  %s468_s15 = sadd.f32 %s467_s2, %s1816_s26 }
 0x18a   :  { %s474_s1 = sadd.f32 %s473_s3, %s1825_s9 }
 0x18b   :  { %s463_s21 = smul.f32 %s462_s23, %s461_s27  ;;  %s464_s10 = ssub.f32 %s462_s23, %s1472_s17 }
 0x18d   :  { %s465_s25 = smul.f32 %s464_s10, %s461_s27  ;;  %s469_s16 = sadd.f32 %s468_s15, %s463_s21 }
 0x18f   :  { %s470_s28 = smul.f32 %s1841_s29, %s469_s16  ;;  %s475_s30 = sadd.f32 %s474_s1, %s465_s25 }
 0x191   :  { %s1853_s8 = ssub.f32 %s1805_s0, %s470_s28  ;;  %s476_s11 = smul.f32 %s1841_s29, %s475_s30 }
 0x193   :  { %s1857_s12 = sadd.f32 %s476_s11, %s1809_s19  ;;  %s478_s26 = smul.f32 %s1853_s8, %s1466_s14 }
 0x195   :  { %s1862_s9 = smul.f32 %s478_s26, %s1857_s12  ;;  %s480_s24 = ssub.f32 %s478_s26, %s1472_s17 }
 0x197   :  { %s1866_s0 = smul.f32 %s480_s24, %s1857_s12 }
 0x198   :  { %s482_s6 = smul.f32 %s1801_s4, %s1862_s9 }
 0x199   :  { %s484_s18 = smul.f32 %s1801_s4, %s1866_s0 }
 0x19a   :  { %s483_s20 = ssub.f32 %s1853_s8, %s482_s6 }
 0x19b   :  { %s485_s19 = sadd.f32 %s484_s18, %s1857_s12 }
 0x19c   :  { %s486_s13 = smul.f32 %s483_s20, %s1466_s14 }
 0x19e   :  { %s487_s2 = smul.f32 %s486_s13, %s485_s19  ;;  %s488_s27 = ssub.f32 %s486_s13, %s1472_s17 }
 0x1a0   :  { %s489_s3 = smul.f32 %s488_s27, %s485_s19 }
 0x1a1   :  { %s490_s23 = smul.f32 %s1801_s4, %s487_s2 }
 0x1a2   :  { %s492_s15 = smul.f32 %s1801_s4, %s489_s3 }
 0x1a3   :  { %s491_s1 = ssub.f32 %s1853_s8, %s490_s23 }
 0x1a4   :  { %s493_s21 = sadd.f32 %s492_s15, %s1857_s12 }
 0x1a5   :  { %s494_s10 = smul.f32 %s491_s1, %s1466_s14 }
 0x1a7   :  { %s495_s25 = smul.f32 %s494_s10, %s493_s21  ;;  %s496_s16 = ssub.f32 %s494_s10, %s1472_s17 }
 0x1a9   :  { %s497_s28 = smul.f32 %s496_s16, %s493_s21  ;;  %s506_s30 = sadd.f32 %s495_s25, %s487_s2 }
 0x1aa   :  { %s498_s11 = smul.f32 %s1834_s7, %s495_s25 }
 0x1ab   :  { %s500_s26 = smul.f32 %s1834_s7, %s497_s28  ;;  %s512_s24 = sadd.f32 %s497_s28, %s489_s3 }
 0x1ac   :  { %s499_s6 = ssub.f32 %s1853_s8, %s498_s11  ;;  %s507_s18 = smul.f32 2.0, %s506_s30 }
 0x1ad   :  { %s501_s20 = sadd.f32 %s500_s26, %s1857_s12  ;;  %s513_s19 = smul.f32 2.0, %s512_s24 }
 0x1ae   :  { %s502_s13 = smul.f32 %s499_s6, %s1466_s14  ;;  %s508_s27 = sadd.f32 %s507_s18, %s1862_s9 }
 0x1af   :  { %s514_s23 = sadd.f32 %s513_s19, %s1866_s0 }
 0x1b0   :  { %s503_s15 = smul.f32 %s502_s13, %s501_s20  ;;  %s504_s1 = ssub.f32 %s502_s13, %s1472_s17 }
 0x1b2   :  { %s505_s2 = smul.f32 %s504_s1, %s501_s20  ;;  %s509_s21 = sadd.f32 %s508_s27, %s503_s15 }
 0x1b4   :  { %s510_s10 = smul.f32 %s1841_s29, %s509_s21  ;;  %s515_s3 = sadd.f32 %s514_s23, %s505_s2 }
 0x1b6   :  { %s1892_s25 = ssub.f32 %s1853_s8, %s510_s10  ;;  %s516_s16 = smul.f32 %s1841_s29, %s515_s3 }
 0x1b8   :  { %s1896_s28 = sadd.f32 %s516_s16, %s1857_s12  ;;  %s518_s9 = smul.f32 %s1892_s25, %s1466_s14 }
 0x1ba   :  { %s1901_s0 = smul.f32 %s518_s9, %s1896_s28  ;;  %s520_s30 = ssub.f32 %s518_s9, %s1472_s17 }
 0x1bc   :  { %s1905_s8 = smul.f32 %s520_s30, %s1896_s28 }
 0x1bd   :  { %s522_s11 = smul.f32 %s1801_s4, %s1901_s0 }
 0x1be   :  { %s524_s26 = smul.f32 %s1801_s4, %s1905_s8 }
 0x1bf   :  { %s523_s24 = ssub.f32 %s1892_s25, %s522_s11 }
 0x1c0   :  { %s525_s12 = sadd.f32 %s524_s26, %s1896_s28 }
 0x1c1   :  { %s526_s6 = smul.f32 %s523_s24, %s1466_s14 }
 0x1c3   :  { %s527_s18 = smul.f32 %s526_s6, %s525_s12  ;;  %s528_s20 = ssub.f32 %s526_s6, %s1472_s17 }
 0x1c5   :  { %s529_s19 = smul.f32 %s528_s20, %s525_s12 }
 0x1c6   :  { %s530_s13 = smul.f32 %s1801_s4, %s527_s18 }
 0x1c7   :  { %s532_s27 = smul.f32 %s1801_s4, %s529_s19 }
 0x1c8   :  { %s531_s23 = ssub.f32 %s1892_s25, %s530_s13 }
 0x1c9   :  { %s533_s15 = sadd.f32 %s532_s27, %s1896_s28 }
 0x1ca   :  { %s534_s1 = smul.f32 %s531_s23, %s1466_s14 }
 0x1cc   :  { %s535_s2 = smul.f32 %s534_s1, %s533_s15  ;;  %s536_s21 = ssub.f32 %s534_s1, %s1472_s17 }
 0x1ce   :  { %s537_s10 = smul.f32 %s536_s21, %s533_s15  ;;  %s546_s3 = sadd.f32 %s535_s2, %s527_s18 }
 0x1cf   :  { %s538_s16 = smul.f32 %s1834_s7, %s535_s2 }
 0x1d0   :  { %s540_s9 = smul.f32 %s1834_s7, %s537_s10  ;;  %s552_s30 = sadd.f32 %s537_s10, %s529_s19 }
 0x1d1   :  { %s539_s11 = ssub.f32 %s1892_s25, %s538_s16  ;;  %s547_s26 = smul.f32 2.0, %s546_s3 }
 0x1d2   :  { %s541_s24 = sadd.f32 %s540_s9, %s1896_s28  ;;  %s553_s12 = smul.f32 2.0, %s552_s30 }
 0x1d3   :  { %s542_s6 = smul.f32 %s539_s11, %s1466_s14  ;;  %s548_s20 = sadd.f32 %s547_s26, %s1901_s0 }
 0x1d4   :  { %s554_s13 = sadd.f32 %s553_s12, %s1905_s8 }
 0x1d5   :  { %s543_s27 = smul.f32 %s542_s6, %s541_s24  ;;  %s544_s23 = ssub.f32 %s542_s6, %s1472_s17 }
 0x1d7   :  { %s545_s18 = smul.f32 %s544_s23, %s541_s24  ;;  %s549_s15 = sadd.f32 %s548_s20, %s543_s27 }
 0x1d9   :  { %s550_s1 = smul.f32 %s1841_s29, %s549_s15  ;;  %s555_s19 = sadd.f32 %s554_s13, %s545_s18 }
 0x1db   :  { %s1931_s2 = ssub.f32 %s1892_s25, %s550_s1  ;;  %s556_s21 = smul.f32 %s1841_s29, %s555_s19 }
 0x1dd   :  { %s1935_s10 = sadd.f32 %s556_s21, %s1896_s28  ;;  %s558_s0 = smul.f32 %s1931_s2, %s1466_s14 }
 0x1df   :  { %s1940_s8 = smul.f32 %s558_s0, %s1935_s10  ;;  %s560_s3 = ssub.f32 %s558_s0, %s1472_s17 }
 0x1e1   :  { %s1944_s25 = smul.f32 %s560_s3, %s1935_s10 }
 0x1e2   :  { %s562_s16 = smul.f32 %s1801_s4, %s1940_s8 }
 0x1e3   :  { %s564_s9 = smul.f32 %s1801_s4, %s1944_s25 }
 0x1e4   :  { %s563_s30 = ssub.f32 %s1931_s2, %s562_s16 }
 0x1e5   :  { %s565_s28 = sadd.f32 %s564_s9, %s1935_s10 }
 0x1e6   :  { %s566_s11 = smul.f32 %s563_s30, %s1466_s14 }
 0x1e8   :  { %s567_s26 = smul.f32 %s566_s11, %s565_s28  ;;  %s568_s24 = ssub.f32 %s566_s11, %s1472_s17 }
 0x1ea   :  { %s569_s12 = smul.f32 %s568_s24, %s565_s28 }
 0x1eb   :  { %s570_s6 = smul.f32 %s1801_s4, %s567_s26 }
 0x1ec   :  { %s572_s20 = smul.f32 %s1801_s4, %s569_s12 }
 0x1ed   :  { %s571_s13 = ssub.f32 %s1931_s2, %s570_s6 }
 0x1ee   :  { %s573_s27 = sadd.f32 %s572_s20, %s1935_s10 }
 0x1ef   :  { %s574_s23 = smul.f32 %s571_s13, %s1466_s14 }
 0x1f1   :  { %s575_s18 = smul.f32 %s574_s23, %s573_s27  ;;  %s576_s15 = ssub.f32 %s574_s23, %s1472_s17 }
 0x1f3   :  { %s577_s1 = smul.f32 %s576_s15, %s573_s27  ;;  %s586_s19 = sadd.f32 %s575_s18, %s567_s26 }
 0x1f4   :  { %s578_s21 = smul.f32 %s1834_s7, %s575_s18  ;;  %s1968_s27 = sld [smem:[#allocation7 + $0x3]] }
 0x1f5   :  { %s580_s0 = smul.f32 %s1834_s7, %s577_s1  ;;  %s592_s3 = sadd.f32 %s577_s1, %s569_s12 }
 0x1f6   :  { %s579_s16 = ssub.f32 %s1931_s2, %s578_s21  ;;  %s587_s9 = smul.f32 2.0, %s586_s19 }
 0x1f7   :  { %s581_s4 = sadd.f32 %s580_s0, %s1935_s10  ;;  %s593_s30 = smul.f32 2.0, %s592_s3 }
 0x1f8   :  { %s582_s28 = smul.f32 %s579_s16, %s1466_s14  ;;  %s588_s11 = sadd.f32 %s587_s9, %s1940_s8 }
 0x1f9   :  { %s594_s24 = sadd.f32 %s593_s30, %s1944_s25 }
 0x1fa   :  { %s583_s6 = smul.f32 %s582_s28, %s581_s4  ;;  %s584_s20 = ssub.f32 %s582_s28, %s1472_s17 }
 0x1fc   :  { %s585_s26 = smul.f32 %s584_s20, %s581_s4  ;;  %s589_s13 = sadd.f32 %s588_s11, %s583_s6 }
 0x1fd   :  { %s2001_s11 = sld [smem:[#allocation5 + $0x3]] }
 0x1fe   :  { %s590_s7 = smul.f32 %s1841_s29, %s589_s13  ;;  %s595_s12 = sadd.f32 %s594_s24, %s585_s26 }
 0x200   :  { %s1972_s23 = ssub.f32 %s1931_s2, %s590_s7  ;;  %s596_s8 = smul.f32 %s1841_s29, %s595_s12 }
 0x202   :  { %s1976_s25 = sadd.f32 %s596_s8, %s1935_s10  ;;  %s609_s18 = smul.f32 %s1972_s23, %s1466_s14 }
 0x203   :  { %599 = sst [smem:[#allocation11 + $0x180]] %s1972_s23 }
 0x204   :  { %601 = sst [smem:[#allocation11 + $0x181]] %s1976_s25  ;;  %s1983_s15 = smul.f32 %s609_s18, %s1976_s25 }
 0x205   :  { %s602_s2 = ssub.f32 %s1485_s22, %s1972_s23 }
 0x206   :  { %s611_s1 = ssub.f32 %s609_s18, %s1472_s17  ;;  %s613_s29 = smul.f32 %s1968_s27, %s1983_s15 }
 0x207   :  { %s603_s10 = ssub.f32 %s602_s2, %s1976_s25 }
 0x208   :  { %s1992_s19 = smul.f32 %s611_s1, %s1976_s25  ;;  %s614_s21 = ssub.f32 %s1972_s23, %s613_s29 }
 0x209   :  { %605 = sst [smem:[#allocation11 + $0x182]] %s603_s10 }
 0x20a   :  { %s615_s0 = smul.f32 %s1968_s27, %s1992_s19  ;;  %s2008_s18 = sld [smem:[#allocation8 + $0x3]] }
 0x20b   :  { %s617_s3 = smul.f32 %s614_s21, %s1466_s14 }
 0x20c   :  { %s616_s16 = sadd.f32 %s615_s0, %s1976_s25 }
 0x20d   :  { %s619_s9 = ssub.f32 %s617_s3, %s1472_s17 }
 0x20e   :  { %s618_s4 = smul.f32 %s617_s3, %s616_s16 }
 0x20f   :  { %s620_s30 = smul.f32 %s619_s9, %s616_s16 }
 0x210   :  { %s621_s28 = smul.f32 %s1968_s27, %s618_s4 }
 0x211   :  { %s623_s24 = smul.f32 %s1968_s27, %s620_s30 }
 0x212   :  { %s622_s6 = ssub.f32 %s1972_s23, %s621_s28 }
 0x213   :  { %s624_s20 = sadd.f32 %s623_s24, %s1976_s25 }
 0x214   :  { %s625_s26 = smul.f32 %s622_s6, %s1466_s14 }
 0x216   :  { %s626_s13 = smul.f32 %s625_s26, %s624_s20  ;;  %s627_s7 = ssub.f32 %s625_s26, %s1472_s17 }
 0x218   :  { %s628_s12 = smul.f32 %s627_s7, %s624_s20  ;;  %s637_s8 = sadd.f32 %s626_s13, %s618_s4 }
 0x219   :  { %s629_s2 = smul.f32 %s2001_s11, %s626_s13 }
 0x21a   :  { %s631_s1 = smul.f32 %s2001_s11, %s628_s12  ;;  %s643_s29 = sadd.f32 %s628_s12, %s620_s30 }
 0x21b   :  { %s630_s10 = ssub.f32 %s1972_s23, %s629_s2  ;;  %s638_s21 = smul.f32 2.0, %s637_s8 }
 0x21c   :  { %s632_s0 = sadd.f32 %s631_s1, %s1976_s25  ;;  %s644_s3 = smul.f32 2.0, %s643_s29 }
 0x21d   :  { %s633_s16 = smul.f32 %s630_s10, %s1466_s14  ;;  %s639_s9 = sadd.f32 %s638_s21, %s1983_s15 }
 0x21e   :  { %s645_s4 = sadd.f32 %s644_s3, %s1992_s19 }
 0x21f   :  { %s634_s28 = smul.f32 %s633_s16, %s632_s0  ;;  %s635_s24 = ssub.f32 %s633_s16, %s1472_s17 }
 0x221   :  { %s636_s6 = smul.f32 %s635_s24, %s632_s0  ;;  %s640_s20 = sadd.f32 %s639_s9, %s634_s28 }
 0x223   :  { %s641_s26 = smul.f32 %s2008_s18, %s640_s20  ;;  %s646_s30 = sadd.f32 %s645_s4, %s636_s6 }
 0x225   :  { %s2020_s13 = ssub.f32 %s1972_s23, %s641_s26  ;;  %s647_s7 = smul.f32 %s2008_s18, %s646_s30 }
 0x227   :  { %s2024_s12 = sadd.f32 %s647_s7, %s1976_s25  ;;  %s649_s15 = smul.f32 %s2020_s13, %s1466_s14 }
 0x229   :  { %s2029_s19 = smul.f32 %s649_s15, %s2024_s12  ;;  %s651_s8 = ssub.f32 %s649_s15, %s1472_s17 }
 0x22b   :  { %s2033_s23 = smul.f32 %s651_s8, %s2024_s12 }
 0x22c   :  { %s653_s2 = smul.f32 %s1968_s27, %s2029_s19 }
 0x22d   :  { %s655_s1 = smul.f32 %s1968_s27, %s2033_s23 }
 0x22e   :  { %s654_s29 = ssub.f32 %s2020_s13, %s653_s2 }
 0x22f   :  { %s656_s25 = sadd.f32 %s655_s1, %s2024_s12 }
 0x230   :  { %s657_s10 = smul.f32 %s654_s29, %s1466_s14 }
 0x232   :  { %s658_s21 = smul.f32 %s657_s10, %s656_s25  ;;  %s659_s0 = ssub.f32 %s657_s10, %s1472_s17 }
 0x234   :  { %s660_s3 = smul.f32 %s659_s0, %s656_s25 }
 0x235   :  { %s661_s16 = smul.f32 %s1968_s27, %s658_s21 }
 0x236   :  { %s663_s9 = smul.f32 %s1968_s27, %s660_s3 }
 0x237   :  { %s662_s4 = ssub.f32 %s2020_s13, %s661_s16 }
 0x238   :  { %s664_s28 = sadd.f32 %s663_s9, %s2024_s12 }
 0x239   :  { %s665_s24 = smul.f32 %s662_s4, %s1466_s14 }
 0x23b   :  { %s666_s6 = smul.f32 %s665_s24, %s664_s28  ;;  %s667_s20 = ssub.f32 %s665_s24, %s1472_s17 }
 0x23d   :  { %s668_s26 = smul.f32 %s667_s20, %s664_s28  ;;  %s677_s30 = sadd.f32 %s666_s6, %s658_s21 }
 0x23e   :  { %s669_s7 = smul.f32 %s2001_s11, %s666_s6 }
 0x23f   :  { %s671_s15 = smul.f32 %s2001_s11, %s668_s26  ;;  %s683_s8 = sadd.f32 %s668_s26, %s660_s3 }
 0x240   :  { %s670_s2 = ssub.f32 %s2020_s13, %s669_s7  ;;  %s678_s1 = smul.f32 2.0, %s677_s30 }
 0x241   :  { %s672_s29 = sadd.f32 %s671_s15, %s2024_s12  ;;  %s684_s25 = smul.f32 2.0, %s683_s8 }
 0x242   :  { %s673_s10 = smul.f32 %s670_s2, %s1466_s14  ;;  %s679_s0 = sadd.f32 %s678_s1, %s2029_s19 }
 0x243   :  { %s685_s16 = sadd.f32 %s684_s25, %s2033_s23 }
 0x244   :  { %s674_s9 = smul.f32 %s673_s10, %s672_s29  ;;  %s675_s4 = ssub.f32 %s673_s10, %s1472_s17 }
 0x246   :  { %s676_s21 = smul.f32 %s675_s4, %s672_s29  ;;  %s680_s28 = sadd.f32 %s679_s0, %s674_s9 }
 0x248   :  { %s681_s24 = smul.f32 %s2008_s18, %s680_s28  ;;  %s686_s3 = sadd.f32 %s685_s16, %s676_s21 }
 0x24a   :  { %s2059_s6 = ssub.f32 %s2020_s13, %s681_s24  ;;  %s687_s20 = smul.f32 %s2008_s18, %s686_s3 }
 0x24c   :  { %s2063_s26 = sadd.f32 %s687_s20, %s2024_s12  ;;  %s689_s19 = smul.f32 %s2059_s6, %s1466_s14 }
 0x24e   :  { %s2068_s23 = smul.f32 %s689_s19, %s2063_s26  ;;  %s691_s30 = ssub.f32 %s689_s19, %s1472_s17 }
 0x250   :  { %s2072_s13 = smul.f32 %s691_s30, %s2063_s26 }
 0x251   :  { %s693_s7 = smul.f32 %s1968_s27, %s2068_s23 }
 0x252   :  { %s695_s15 = smul.f32 %s1968_s27, %s2072_s13 }
 0x253   :  { %s694_s8 = ssub.f32 %s2059_s6, %s693_s7 }
 0x254   :  { %s696_s12 = sadd.f32 %s695_s15, %s2063_s26 }
 0x255   :  { %s697_s2 = smul.f32 %s694_s8, %s1466_s14 }
 0x257   :  { %s698_s1 = smul.f32 %s697_s2, %s696_s12  ;;  %s699_s29 = ssub.f32 %s697_s2, %s1472_s17 }
 0x259   :  { %s700_s25 = smul.f32 %s699_s29, %s696_s12 }
 0x25a   :  { %s701_s10 = smul.f32 %s1968_s27, %s698_s1 }
 0x25b   :  { %s703_s0 = smul.f32 %s1968_s27, %s700_s25 }
 0x25c   :  { %s702_s16 = ssub.f32 %s2059_s6, %s701_s10 }
 0x25d   :  { %s704_s9 = sadd.f32 %s703_s0, %s2063_s26 }
 0x25e   :  { %s705_s4 = smul.f32 %s702_s16, %s1466_s14 }
 0x260   :  { %s706_s21 = smul.f32 %s705_s4, %s704_s9  ;;  %s707_s28 = ssub.f32 %s705_s4, %s1472_s17 }
 0x262   :  { %s708_s24 = smul.f32 %s707_s28, %s704_s9  ;;  %s717_s3 = sadd.f32 %s706_s21, %s698_s1 }
 0x263   :  { %s709_s20 = smul.f32 %s2001_s11, %s706_s21 }
 0x264   :  { %s711_s19 = smul.f32 %s2001_s11, %s708_s24  ;;  %s723_s30 = sadd.f32 %s708_s24, %s700_s25 }
 0x265   :  { %s710_s7 = ssub.f32 %s2059_s6, %s709_s20  ;;  %s718_s15 = smul.f32 2.0, %s717_s3 }
 0x266   :  { %s712_s8 = sadd.f32 %s711_s19, %s2063_s26  ;;  %s724_s12 = smul.f32 2.0, %s723_s30 }
 0x267   :  { %s713_s2 = smul.f32 %s710_s7, %s1466_s14  ;;  %s719_s29 = sadd.f32 %s718_s15, %s2068_s23 }
 0x268   :  { %s725_s10 = sadd.f32 %s724_s12, %s2072_s13 }
 0x269   :  { %s714_s0 = smul.f32 %s713_s2, %s712_s8  ;;  %s715_s16 = ssub.f32 %s713_s2, %s1472_s17 }
 0x26b   :  { %s716_s1 = smul.f32 %s715_s16, %s712_s8  ;;  %s720_s9 = sadd.f32 %s719_s29, %s714_s0 }
 0x26d   :  { %s721_s4 = smul.f32 %s2008_s18, %s720_s9  ;;  %s726_s25 = sadd.f32 %s725_s10, %s716_s1 }
 0x26f   :  { %s2098_s21 = ssub.f32 %s2059_s6, %s721_s4  ;;  %s727_s28 = smul.f32 %s2008_s18, %s726_s25 }
 0x271   :  { %s2102_s24 = sadd.f32 %s727_s28, %s2063_s26  ;;  %s729_s23 = smul.f32 %s2098_s21, %s1466_s14 }
 0x273   :  { %s2107_s13 = smul.f32 %s729_s23, %s2102_s24  ;;  %s731_s3 = ssub.f32 %s729_s23, %s1472_s17 }
 0x275   :  { %s2111_s6 = smul.f32 %s731_s3, %s2102_s24 }
 0x276   :  { %s733_s20 = smul.f32 %s1968_s27, %s2107_s13 }
 0x277   :  { %s735_s19 = smul.f32 %s1968_s27, %s2111_s6 }
 0x278   :  { %s734_s30 = ssub.f32 %s2098_s21, %s733_s20 }
 0x279   :  { %s736_s26 = sadd.f32 %s735_s19, %s2102_s24 }
 0x27a   :  { %s737_s7 = smul.f32 %s734_s30, %s1466_s14 }
 0x27c   :  { %s738_s15 = smul.f32 %s737_s7, %s736_s26  ;;  %s739_s8 = ssub.f32 %s737_s7, %s1472_s17 }
 0x27e   :  { %s740_s12 = smul.f32 %s739_s8, %s736_s26 }
 0x27f   :  { %s741_s2 = smul.f32 %s1968_s27, %s738_s15 }
 0x280   :  { %s743_s29 = smul.f32 %s1968_s27, %s740_s12 }
 0x281   :  { %s742_s10 = ssub.f32 %s2098_s21, %s741_s2 }
 0x282   :  { %s744_s0 = sadd.f32 %s743_s29, %s2102_s24 }
 0x283   :  { %s745_s16 = smul.f32 %s742_s10, %s1466_s14 }
 0x285   :  { %s746_s1 = smul.f32 %s745_s16, %s744_s0  ;;  %s747_s9 = ssub.f32 %s745_s16, %s1472_s17 }
 0x287   :  { %s748_s4 = smul.f32 %s747_s9, %s744_s0  ;;  %s757_s25 = sadd.f32 %s746_s1, %s738_s15 }
 0x288   :  { %s749_s28 = smul.f32 %s2001_s11, %s746_s1  ;;  %s2135_s0 = sld [smem:[#allocation7 + $0x4]] }
 0x289   :  { %s751_s23 = smul.f32 %s2001_s11, %s748_s4  ;;  %s763_s3 = sadd.f32 %s748_s4, %s740_s12 }
 0x28a   :  { %s750_s20 = ssub.f32 %s2098_s21, %s749_s28  ;;  %s758_s19 = smul.f32 2.0, %s757_s25 }
 0x28b   :  { %s752_s27 = sadd.f32 %s751_s23, %s2102_s24  ;;  %s764_s30 = smul.f32 2.0, %s763_s3 }
 0x28c   :  { %s753_s26 = smul.f32 %s750_s20, %s1466_s14  ;;  %s759_s7 = sadd.f32 %s758_s19, %s2107_s13 }
 0x28d   :  { %s765_s8 = sadd.f32 %s764_s30, %s2111_s6 }
 0x28e   :  { %s754_s2 = smul.f32 %s753_s26, %s752_s27  ;;  %s755_s29 = ssub.f32 %s753_s26, %s1472_s17 }
 0x290   :  { %s756_s15 = smul.f32 %s755_s29, %s752_s27  ;;  %s760_s10 = sadd.f32 %s759_s7, %s754_s2 }
 0x291   :  { %s2168_s7 = sld [smem:[#allocation5 + $0x4]] }
 0x292   :  { %s761_s11 = smul.f32 %s2008_s18, %s760_s10  ;;  %s766_s12 = sadd.f32 %s765_s8, %s756_s15 }
 0x294   :  { %s2139_s16 = ssub.f32 %s2098_s21, %s761_s11  ;;  %s767_s13 = smul.f32 %s2008_s18, %s766_s12 }
 0x296   :  { %s2143_s6 = sadd.f32 %s767_s13, %s2102_s24  ;;  %s780_s1 = smul.f32 %s2139_s16, %s1466_s14 }
 0x297   :  { %770 = sst [smem:[#allocation11 + $0x200]] %s2139_s16 }
 0x298   :  { %772 = sst [smem:[#allocation11 + $0x201]] %s2143_s6  ;;  %s2150_s9 = smul.f32 %s780_s1, %s2143_s6 }
 0x299   :  { %s773_s21 = ssub.f32 %s1485_s22, %s2139_s16 }
 0x29a   :  { %s782_s4 = ssub.f32 %s780_s1, %s1472_s17  ;;  %s784_s18 = smul.f32 %s2135_s0, %s2150_s9 }
 0x29b   :  { %s774_s24 = ssub.f32 %s773_s21, %s2143_s6 }
 0x29c   :  { %s2159_s25 = smul.f32 %s782_s4, %s2143_s6  ;;  %s785_s28 = ssub.f32 %s2139_s16, %s784_s18 }
 0x29d   :  { %776 = sst [smem:[#allocation11 + $0x202]] %s774_s24 }
 0x29e   :  { %s786_s23 = smul.f32 %s2135_s0, %s2159_s25  ;;  %s2175_s1 = sld [smem:[#allocation8 + $0x4]] }
 0x29f   :  { %s788_s3 = smul.f32 %s785_s28, %s1466_s14 }
 0x2a0   :  { %s787_s20 = sadd.f32 %s786_s23, %s2143_s6 }
 0x2a1   :  { %s790_s19 = ssub.f32 %s788_s3, %s1472_s17 }
 0x2a2   :  { %s789_s27 = smul.f32 %s788_s3, %s787_s20 }
 0x2a3   :  { %s791_s30 = smul.f32 %s790_s19, %s787_s20 }
 0x2a4   :  { %s792_s26 = smul.f32 %s2135_s0, %s789_s27 }
 0x2a5   :  { %s794_s8 = smul.f32 %s2135_s0, %s791_s30 }
 0x2a6   :  { %s793_s2 = ssub.f32 %s2139_s16, %s792_s26 }
 0x2a7   :  { %s795_s29 = sadd.f32 %s794_s8, %s2143_s6 }
 0x2a8   :  { %s796_s15 = smul.f32 %s793_s2, %s1466_s14 }
 0x2aa   :  { %s797_s10 = smul.f32 %s796_s15, %s795_s29  ;;  %s798_s11 = ssub.f32 %s796_s15, %s1472_s17 }
 0x2ac   :  { %s799_s12 = smul.f32 %s798_s11, %s795_s29  ;;  %s808_s13 = sadd.f32 %s797_s10, %s789_s27 }
 0x2ad   :  { %s800_s21 = smul.f32 %s2168_s7, %s797_s10 }
 0x2ae   :  { %s802_s4 = smul.f32 %s2168_s7, %s799_s12  ;;  %s814_s18 = sadd.f32 %s799_s12, %s791_s30 }
 0x2af   :  { %s801_s24 = ssub.f32 %s2139_s16, %s800_s21  ;;  %s809_s28 = smul.f32 2.0, %s808_s13 }
 0x2b0   :  { %s803_s23 = sadd.f32 %s802_s4, %s2143_s6  ;;  %s815_s3 = smul.f32 2.0, %s814_s18 }
 0x2b1   :  { %s804_s20 = smul.f32 %s801_s24, %s1466_s14  ;;  %s810_s19 = sadd.f32 %s809_s28, %s2150_s9 }
 0x2b2   :  { %s816_s27 = sadd.f32 %s815_s3, %s2159_s25 }
 0x2b3   :  { %s805_s26 = smul.f32 %s804_s20, %s803_s23  ;;  %s806_s8 = ssub.f32 %s804_s20, %s1472_s17 }
 0x2b5   :  { %s807_s2 = smul.f32 %s806_s8, %s803_s23  ;;  %s811_s29 = sadd.f32 %s810_s19, %s805_s26 }
 0x2b7   :  { %s812_s15 = smul.f32 %s2175_s1, %s811_s29  ;;  %s817_s30 = sadd.f32 %s816_s27, %s807_s2 }
 0x2b9   :  { %s2187_s10 = ssub.f32 %s2139_s16, %s812_s15  ;;  %s818_s11 = smul.f32 %s2175_s1, %s817_s30 }
 0x2bb   :  { %s2191_s12 = sadd.f32 %s818_s11, %s2143_s6  ;;  %s820_s9 = smul.f32 %s2187_s10, %s1466_s14 }
 0x2bd   :  { %s2196_s25 = smul.f32 %s820_s9, %s2191_s12  ;;  %s822_s13 = ssub.f32 %s820_s9, %s1472_s17 }
 0x2bf   :  { %s2200_s16 = smul.f32 %s822_s13, %s2191_s12 }
 0x2c0   :  { %s824_s21 = smul.f32 %s2135_s0, %s2196_s25 }
 0x2c1   :  { %s826_s4 = smul.f32 %s2135_s0, %s2200_s16 }
 0x2c2   :  { %s825_s18 = ssub.f32 %s2187_s10, %s824_s21 }
 0x2c3   :  { %s827_s6 = sadd.f32 %s826_s4, %s2191_s12 }
 0x2c4   :  { %s828_s24 = smul.f32 %s825_s18, %s1466_s14 }
 0x2c6   :  { %s829_s28 = smul.f32 %s828_s24, %s827_s6  ;;  %s830_s23 = ssub.f32 %s828_s24, %s1472_s17 }
 0x2c8   :  { %s831_s3 = smul.f32 %s830_s23, %s827_s6 }
 0x2c9   :  { %s832_s20 = smul.f32 %s2135_s0, %s829_s28 }
 0x2ca   :  { %s834_s19 = smul.f32 %s2135_s0, %s831_s3 }
 0x2cb   :  { %s833_s27 = ssub.f32 %s2187_s10, %s832_s20 }
 0x2cc   :  { %s835_s26 = sadd.f32 %s834_s19, %s2191_s12 }
 0x2cd   :  { %s836_s8 = smul.f32 %s833_s27, %s1466_s14 }
 0x2cf   :  { %s837_s2 = smul.f32 %s836_s8, %s835_s26  ;;  %s838_s29 = ssub.f32 %s836_s8, %s1472_s17 }
 0x2d1   :  { %s839_s15 = smul.f32 %s838_s29, %s835_s26  ;;  %s848_s30 = sadd.f32 %s837_s2, %s829_s28 }
 0x2d2   :  { %s840_s11 = smul.f32 %s2168_s7, %s837_s2 }
 0x2d3   :  { %s842_s9 = smul.f32 %s2168_s7, %s839_s15  ;;  %s854_s13 = sadd.f32 %s839_s15, %s831_s3 }
 0x2d4   :  { %s841_s21 = ssub.f32 %s2187_s10, %s840_s11  ;;  %s849_s4 = smul.f32 2.0, %s848_s30 }
 0x2d5   :  { %s843_s18 = sadd.f32 %s842_s9, %s2191_s12  ;;  %s855_s6 = smul.f32 2.0, %s854_s13 }
 0x2d6   :  { %s844_s24 = smul.f32 %s841_s21, %s1466_s14  ;;  %s850_s23 = sadd.f32 %s849_s4, %s2196_s25 }
 0x2d7   :  { %s856_s20 = sadd.f32 %s855_s6, %s2200_s16 }
 0x2d8   :  { %s845_s19 = smul.f32 %s844_s24, %s843_s18  ;;  %s846_s27 = ssub.f32 %s844_s24, %s1472_s17 }
 0x2da   :  { %s847_s28 = smul.f32 %s846_s27, %s843_s18  ;;  %s851_s26 = sadd.f32 %s850_s23, %s845_s19 }
 0x2dc   :  { %s852_s8 = smul.f32 %s2175_s1, %s851_s26  ;;  %s857_s3 = sadd.f32 %s856_s20, %s847_s28 }
 0x2de   :  { %s2226_s2 = ssub.f32 %s2187_s10, %s852_s8  ;;  %s858_s29 = smul.f32 %s2175_s1, %s857_s3 }
 0x2e0   :  { %s2230_s15 = sadd.f32 %s858_s29, %s2191_s12  ;;  %s860_s25 = smul.f32 %s2226_s2, %s1466_s14 }
 0x2e2   :  { %s2235_s16 = smul.f32 %s860_s25, %s2230_s15  ;;  %s862_s30 = ssub.f32 %s860_s25, %s1472_s17 }
 0x2e4   :  { %s2239_s10 = smul.f32 %s862_s30, %s2230_s15 }
 0x2e5   :  { %s864_s11 = smul.f32 %s2135_s0, %s2235_s16 }
 0x2e6   :  { %s866_s9 = smul.f32 %s2135_s0, %s2239_s10 }
 0x2e7   :  { %s865_s13 = ssub.f32 %s2226_s2, %s864_s11 }
 0x2e8   :  { %s867_s12 = sadd.f32 %s866_s9, %s2230_s15 }
 0x2e9   :  { %s868_s21 = smul.f32 %s865_s13, %s1466_s14 }
 0x2eb   :  { %s869_s4 = smul.f32 %s868_s21, %s867_s12  ;;  %s870_s18 = ssub.f32 %s868_s21, %s1472_s17 }
 0x2ed   :  { %s871_s6 = smul.f32 %s870_s18, %s867_s12 }
 0x2ee   :  { %s872_s24 = smul.f32 %s2135_s0, %s869_s4 }
 0x2ef   :  { %s874_s23 = smul.f32 %s2135_s0, %s871_s6 }
 0x2f0   :  { %s873_s20 = ssub.f32 %s2226_s2, %s872_s24 }
 0x2f1   :  { %s875_s19 = sadd.f32 %s874_s23, %s2230_s15 }
 0x2f2   :  { %s876_s27 = smul.f32 %s873_s20, %s1466_s14 }
 0x2f4   :  { %s877_s28 = smul.f32 %s876_s27, %s875_s19  ;;  %s878_s26 = ssub.f32 %s876_s27, %s1472_s17 }
 0x2f6   :  { %s879_s8 = smul.f32 %s878_s26, %s875_s19  ;;  %s888_s3 = sadd.f32 %s877_s28, %s869_s4 }
 0x2f7   :  { %s880_s29 = smul.f32 %s2168_s7, %s877_s28 }
 0x2f8   :  { %s882_s25 = smul.f32 %s2168_s7, %s879_s8  ;;  %s894_s30 = sadd.f32 %s879_s8, %s871_s6 }
 0x2f9   :  { %s881_s11 = ssub.f32 %s2226_s2, %s880_s29  ;;  %s889_s9 = smul.f32 2.0, %s888_s3 }
 0x2fa   :  { %s883_s13 = sadd.f32 %s882_s25, %s2230_s15  ;;  %s895_s12 = smul.f32 2.0, %s894_s30 }
 0x2fb   :  { %s884_s21 = smul.f32 %s881_s11, %s1466_s14  ;;  %s890_s18 = sadd.f32 %s889_s9, %s2235_s16 }
 0x2fc   :  { %s896_s24 = sadd.f32 %s895_s12, %s2239_s10 }
 0x2fd   :  { %s885_s23 = smul.f32 %s884_s21, %s883_s13  ;;  %s886_s20 = ssub.f32 %s884_s21, %s1472_s17 }
 0x2ff   :  { %s887_s4 = smul.f32 %s886_s20, %s883_s13  ;;  %s891_s19 = sadd.f32 %s890_s18, %s885_s23 }
 0x301   :  { %s892_s27 = smul.f32 %s2175_s1, %s891_s19  ;;  %s897_s6 = sadd.f32 %s896_s24, %s887_s4 }
 0x303   :  { %s2265_s28 = ssub.f32 %s2226_s2, %s892_s27  ;;  %s898_s26 = smul.f32 %s2175_s1, %s897_s6 }
 0x305   :  { %s2269_s8 = sadd.f32 %s898_s26, %s2230_s15  ;;  %s900_s16 = smul.f32 %s2265_s28, %s1466_s14 }
 0x307   :  { %s2274_s10 = smul.f32 %s900_s16, %s2269_s8  ;;  %s902_s3 = ssub.f32 %s900_s16, %s1472_s17 }
 0x309   :  { %s2278_s2 = smul.f32 %s902_s3, %s2269_s8 }
 0x30a   :  { %s904_s29 = smul.f32 %s2135_s0, %s2274_s10 }
 0x30b   :  { %s906_s25 = smul.f32 %s2135_s0, %s2278_s2 }
 0x30c   :  { %s905_s30 = ssub.f32 %s2265_s28, %s904_s29 }
 0x30d   :  { %s907_s15 = sadd.f32 %s906_s25, %s2269_s8 }
 0x30e   :  { %s908_s11 = smul.f32 %s905_s30, %s1466_s14 }
 0x310   :  { %s909_s9 = smul.f32 %s908_s11, %s907_s15  ;;  %s910_s13 = ssub.f32 %s908_s11, %s1472_s17 }
 0x312   :  { %s911_s12 = smul.f32 %s910_s13, %s907_s15 }
 0x313   :  { %s912_s21 = smul.f32 %s2135_s0, %s909_s9 }
 0x314   :  { %s914_s18 = smul.f32 %s2135_s0, %s911_s12 }
 0x315   :  { %s913_s24 = ssub.f32 %s2265_s28, %s912_s21 }
 0x316   :  { %s915_s23 = sadd.f32 %s914_s18, %s2269_s8 }
 0x317   :  { %s916_s20 = smul.f32 %s913_s24, %s1466_s14 }
 0x319   :  { %s917_s4 = smul.f32 %s916_s20, %s915_s23  ;;  %s918_s19 = ssub.f32 %s916_s20, %s1472_s17 }
 0x31b   :  { %s919_s27 = smul.f32 %s918_s19, %s915_s23  ;;  %s928_s6 = sadd.f32 %s917_s4, %s909_s9 }
 0x31c   :  { %s920_s26 = smul.f32 %s2168_s7, %s917_s4  ;;  %s2302_s23 = sld [smem:[#allocation7 + $0x5]] }
 0x31d   :  { %s922_s16 = smul.f32 %s2168_s7, %s919_s27  ;;  %s934_s3 = sadd.f32 %s919_s27, %s911_s12 }
 0x31e   :  { %s921_s29 = ssub.f32 %s2265_s28, %s920_s26  ;;  %s929_s25 = smul.f32 2.0, %s928_s6 }
 0x31f   :  { %s923_s0 = sadd.f32 %s922_s16, %s2269_s8  ;;  %s935_s30 = smul.f32 2.0, %s934_s3 }
 0x320   :  { %s924_s15 = smul.f32 %s921_s29, %s1466_s14  ;;  %s930_s11 = sadd.f32 %s929_s25, %s2274_s10 }
 0x321   :  { %s936_s13 = sadd.f32 %s935_s30, %s2278_s2 }
 0x322   :  { %s925_s21 = smul.f32 %s924_s15, %s923_s0  ;;  %s926_s18 = ssub.f32 %s924_s15, %s1472_s17 }
 0x324   :  { %s927_s9 = smul.f32 %s926_s18, %s923_s0  ;;  %s931_s24 = sadd.f32 %s930_s11, %s925_s21 }
 0x325   :  { %s2335_s11 = sld [smem:[#allocation5 + $0x5]] }
 0x326   :  { %s932_s7 = smul.f32 %s2175_s1, %s931_s24  ;;  %s937_s12 = sadd.f32 %s936_s13, %s927_s9 }
 0x328   :  { %s2306_s20 = ssub.f32 %s2265_s28, %s932_s7  ;;  %s938_s10 = smul.f32 %s2175_s1, %s937_s12 }
 0x32a   :  { %s2310_s2 = sadd.f32 %s938_s10, %s2269_s8  ;;  %s951_s4 = smul.f32 %s2306_s20, %s1466_s14 }
 0x32b   :  { %941 = sst [smem:[#allocation11 + $0x280]] %s2306_s20 }
 0x32c   :  { %943 = sst [smem:[#allocation11 + $0x281]] %s2310_s2  ;;  %s2317_s19 = smul.f32 %s951_s4, %s2310_s2 }
 0x32d   :  { %s944_s28 = ssub.f32 %s1485_s22, %s2306_s20 }
 0x32e   :  { %s953_s27 = ssub.f32 %s951_s4, %s1472_s17  ;;  %s955_s1 = smul.f32 %s2302_s23, %s2317_s19 }
 0x32f   :  { %s945_s8 = ssub.f32 %s944_s28, %s2310_s2 }
 0x330   :  { %s2326_s6 = smul.f32 %s953_s27, %s2310_s2  ;;  %s956_s26 = ssub.f32 %s2306_s20, %s955_s1 }
 0x331   :  { %947 = sst [smem:[#allocation11 + $0x282]] %s945_s8 }
 0x332   :  { %s957_s16 = smul.f32 %s2302_s23, %s2326_s6  ;;  %s2342_s4 = sld [smem:[#allocation8 + $0x5]] }
 0x333   :  { %s959_s3 = smul.f32 %s956_s26, %s1466_s14 }
 0x334   :  { %s958_s29 = sadd.f32 %s957_s16, %s2310_s2 }
 0x335   :  { %s961_s25 = ssub.f32 %s959_s3, %s1472_s17 }
 0x336   :  { %s960_s0 = smul.f32 %s959_s3, %s958_s29 }
 0x337   :  { %s962_s30 = smul.f32 %s961_s25, %s958_s29 }
 0x338   :  { %s963_s15 = smul.f32 %s2302_s23, %s960_s0 }
 0x339   :  { %s965_s13 = smul.f32 %s2302_s23, %s962_s30 }
 0x33a   :  { %s964_s21 = ssub.f32 %s2306_s20, %s963_s15 }
 0x33b   :  { %s966_s18 = sadd.f32 %s965_s13, %s2310_s2 }
 0x33c   :  { %s967_s9 = smul.f32 %s964_s21, %s1466_s14 }
 0x33e   :  { %s968_s24 = smul.f32 %s967_s9, %s966_s18  ;;  %s969_s7 = ssub.f32 %s967_s9, %s1472_s17 }
 0x340   :  { %s970_s12 = smul.f32 %s969_s7, %s966_s18  ;;  %s979_s10 = sadd.f32 %s968_s24, %s960_s0 }
 0x341   :  { %s971_s28 = smul.f32 %s2335_s11, %s968_s24 }
 0x342   :  { %s973_s27 = smul.f32 %s2335_s11, %s970_s12  ;;  %s985_s1 = sadd.f32 %s970_s12, %s962_s30 }
 0x343   :  { %s972_s8 = ssub.f32 %s2306_s20, %s971_s28  ;;  %s980_s26 = smul.f32 2.0, %s979_s10 }
 0x344   :  { %s974_s16 = sadd.f32 %s973_s27, %s2310_s2  ;;  %s986_s3 = smul.f32 2.0, %s985_s1 }
 0x345   :  { %s975_s29 = smul.f32 %s972_s8, %s1466_s14  ;;  %s981_s25 = sadd.f32 %s980_s26, %s2317_s19 }
 0x346   :  { %s987_s0 = sadd.f32 %s986_s3, %s2326_s6 }
 0x347   :  { %s976_s15 = smul.f32 %s975_s29, %s974_s16  ;;  %s977_s13 = ssub.f32 %s975_s29, %s1472_s17 }
 0x349   :  { %s978_s21 = smul.f32 %s977_s13, %s974_s16  ;;  %s982_s18 = sadd.f32 %s981_s25, %s976_s15 }
 0x34b   :  { %s983_s9 = smul.f32 %s2342_s4, %s982_s18  ;;  %s988_s30 = sadd.f32 %s987_s0, %s978_s21 }
 0x34d   :  { %s2354_s24 = ssub.f32 %s2306_s20, %s983_s9  ;;  %s989_s7 = smul.f32 %s2342_s4, %s988_s30 }
 0x34f   :  { %s2358_s12 = sadd.f32 %s989_s7, %s2310_s2  ;;  %s991_s19 = smul.f32 %s2354_s24, %s1466_s14 }
 0x351   :  { %s2363_s6 = smul.f32 %s991_s19, %s2358_s12  ;;  %s993_s10 = ssub.f32 %s991_s19, %s1472_s17 }
 0x353   :  { %s2367_s20 = smul.f32 %s993_s10, %s2358_s12 }
 0x354   :  { %s995_s28 = smul.f32 %s2302_s23, %s2363_s6 }
 0x355   :  { %s997_s27 = smul.f32 %s2302_s23, %s2367_s20 }
 0x356   :  { %s996_s1 = ssub.f32 %s2354_s24, %s995_s28 }
 0x357   :  { %s998_s2 = sadd.f32 %s997_s27, %s2358_s12 }
 0x358   :  { %s999_s8 = smul.f32 %s996_s1, %s1466_s14 }
 0x35a   :  { %s1000_s26 = smul.f32 %s999_s8, %s998_s2  ;;  %s1001_s16 = ssub.f32 %s999_s8, %s1472_s17 }
 0x35c   :  { %s1002_s3 = smul.f32 %s1001_s16, %s998_s2 }
 0x35d   :  { %s1003_s29 = smul.f32 %s2302_s23, %s1000_s26 }
 0x35e   :  { %s1005_s25 = smul.f32 %s2302_s23, %s1002_s3 }
 0x35f   :  { %s1004_s0 = ssub.f32 %s2354_s24, %s1003_s29 }
 0x360   :  { %s1006_s15 = sadd.f32 %s1005_s25, %s2358_s12 }
 0x361   :  { %s1007_s13 = smul.f32 %s1004_s0, %s1466_s14 }
 0x363   :  { %s1008_s21 = smul.f32 %s1007_s13, %s1006_s15  ;;  %s1009_s18 = ssub.f32 %s1007_s13, %s1472_s17 }
 0x365   :  { %s1010_s9 = smul.f32 %s1009_s18, %s1006_s15  ;;  %s1019_s30 = sadd.f32 %s1008_s21, %s1000_s26 }
 0x366   :  { %s1011_s7 = smul.f32 %s2335_s11, %s1008_s21 }
 0x367   :  { %s1013_s19 = smul.f32 %s2335_s11, %s1010_s9  ;;  %s1025_s10 = sadd.f32 %s1010_s9, %s1002_s3 }
 0x368   :  { %s1012_s28 = ssub.f32 %s2354_s24, %s1011_s7  ;;  %s1020_s27 = smul.f32 2.0, %s1019_s30 }
 0x369   :  { %s1014_s1 = sadd.f32 %s1013_s19, %s2358_s12  ;;  %s1026_s2 = smul.f32 2.0, %s1025_s10 }
 0x36a   :  { %s1015_s8 = smul.f32 %s1012_s28, %s1466_s14  ;;  %s1021_s16 = sadd.f32 %s1020_s27, %s2363_s6 }
 0x36b   :  { %s1027_s29 = sadd.f32 %s1026_s2, %s2367_s20 }
 0x36c   :  { %s1016_s25 = smul.f32 %s1015_s8, %s1014_s1  ;;  %s1017_s0 = ssub.f32 %s1015_s8, %s1472_s17 }
 0x36e   :  { %s1018_s26 = smul.f32 %s1017_s0, %s1014_s1  ;;  %s1022_s15 = sadd.f32 %s1021_s16, %s1016_s25 }
 0x370   :  { %s1023_s13 = smul.f32 %s2342_s4, %s1022_s15  ;;  %s1028_s3 = sadd.f32 %s1027_s29, %s1018_s26 }
 0x372   :  { %s2393_s21 = ssub.f32 %s2354_s24, %s1023_s13  ;;  %s1029_s18 = smul.f32 %s2342_s4, %s1028_s3 }
 0x374   :  { %s2397_s9 = sadd.f32 %s1029_s18, %s2358_s12  ;;  %s1031_s6 = smul.f32 %s2393_s21, %s1466_s14 }
 0x376   :  { %s2402_s20 = smul.f32 %s1031_s6, %s2397_s9  ;;  %s1033_s30 = ssub.f32 %s1031_s6, %s1472_s17 }
 0x378   :  { %s2406_s24 = smul.f32 %s1033_s30, %s2397_s9 }
 0x379   :  { %s1035_s7 = smul.f32 %s2302_s23, %s2402_s20 }
 0x37a   :  { %s1037_s19 = smul.f32 %s2302_s23, %s2406_s24 }
 0x37b   :  { %s1036_s10 = ssub.f32 %s2393_s21, %s1035_s7 }
 0x37c   :  { %s1038_s12 = sadd.f32 %s1037_s19, %s2397_s9 }
 0x37d   :  { %s1039_s28 = smul.f32 %s1036_s10, %s1466_s14 }
 0x37f   :  { %s1040_s27 = smul.f32 %s1039_s28, %s1038_s12  ;;  %s1041_s1 = ssub.f32 %s1039_s28, %s1472_s17 }
 0x381   :  { %s1042_s2 = smul.f32 %s1041_s1, %s1038_s12 }
 0x382   :  { %s1043_s8 = smul.f32 %s2302_s23, %s1040_s27 }
 0x383   :  { %s1045_s16 = smul.f32 %s2302_s23, %s1042_s2 }
 0x384   :  { %s1044_s29 = ssub.f32 %s2393_s21, %s1043_s8 }
 0x385   :  { %s1046_s25 = sadd.f32 %s1045_s16, %s2397_s9 }
 0x386   :  { %s1047_s0 = smul.f32 %s1044_s29, %s1466_s14 }
 0x388   :  { %s1048_s26 = smul.f32 %s1047_s0, %s1046_s25  ;;  %s1049_s15 = ssub.f32 %s1047_s0, %s1472_s17 }
 0x38a   :  { %s1050_s13 = smul.f32 %s1049_s15, %s1046_s25  ;;  %s1059_s3 = sadd.f32 %s1048_s26, %s1040_s27 }
 0x38b   :  { %s1051_s18 = smul.f32 %s2335_s11, %s1048_s26 }
 0x38c   :  { %s1053_s6 = smul.f32 %s2335_s11, %s1050_s13  ;;  %s1065_s30 = sadd.f32 %s1050_s13, %s1042_s2 }
 0x38d   :  { %s1052_s7 = ssub.f32 %s2393_s21, %s1051_s18  ;;  %s1060_s19 = smul.f32 2.0, %s1059_s3 }
 0x38e   :  { %s1054_s10 = sadd.f32 %s1053_s6, %s2397_s9  ;;  %s1066_s12 = smul.f32 2.0, %s1065_s30 }
 0x38f   :  { %s1055_s28 = smul.f32 %s1052_s7, %s1466_s14  ;;  %s1061_s1 = sadd.f32 %s1060_s19, %s2402_s20 }
 0x390   :  { %s1067_s8 = sadd.f32 %s1066_s12, %s2406_s24 }
 0x391   :  { %s1056_s16 = smul.f32 %s1055_s28, %s1054_s10  ;;  %s1057_s29 = ssub.f32 %s1055_s28, %s1472_s17 }
 0x393   :  { %s1058_s27 = smul.f32 %s1057_s29, %s1054_s10  ;;  %s1062_s25 = sadd.f32 %s1061_s1, %s1056_s16 }
 0x395   :  { %s1063_s0 = smul.f32 %s2342_s4, %s1062_s25  ;;  %s1068_s2 = sadd.f32 %s1067_s8, %s1058_s27 }
 0x397   :  { %s2432_s26 = ssub.f32 %s2393_s21, %s1063_s0  ;;  %s1069_s15 = smul.f32 %s2342_s4, %s1068_s2 }
 0x399   :  { %s2436_s13 = sadd.f32 %s1069_s15, %s2397_s9  ;;  %s1071_s20 = smul.f32 %s2432_s26, %s1466_s14 }
 0x39b   :  { %s2441_s24 = smul.f32 %s1071_s20, %s2436_s13  ;;  %s1073_s3 = ssub.f32 %s1071_s20, %s1472_s17 }
 0x39d   :  { %s2445_s21 = smul.f32 %s1073_s3, %s2436_s13 }
 0x39e   :  { %s1075_s18 = smul.f32 %s2302_s23, %s2441_s24 }
 0x39f   :  { %s1077_s6 = smul.f32 %s2302_s23, %s2445_s21 }
 0x3a0   :  { %s1076_s30 = ssub.f32 %s2432_s26, %s1075_s18 }
 0x3a1   :  { %s1078_s9 = sadd.f32 %s1077_s6, %s2436_s13 }
 0x3a2   :  { %s1079_s7 = smul.f32 %s1076_s30, %s1466_s14 }
 0x3a4   :  { %s1080_s19 = smul.f32 %s1079_s7, %s1078_s9  ;;  %s1081_s10 = ssub.f32 %s1079_s7, %s1472_s17 }
 0x3a6   :  { %s1082_s12 = smul.f32 %s1081_s10, %s1078_s9 }
 0x3a7   :  { %s1083_s28 = smul.f32 %s2302_s23, %s1080_s19 }
 0x3a8   :  { %s1085_s1 = smul.f32 %s2302_s23, %s1082_s12 }
 0x3a9   :  { %s1084_s8 = ssub.f32 %s2432_s26, %s1083_s28 }
 0x3aa   :  { %s1086_s16 = sadd.f32 %s1085_s1, %s2436_s13 }
 0x3ab   :  { %s1087_s29 = smul.f32 %s1084_s8, %s1466_s14 }
 0x3ad   :  { %s1088_s27 = smul.f32 %s1087_s29, %s1086_s16  ;;  %s1089_s25 = ssub.f32 %s1087_s29, %s1472_s17 }
 0x3af   :  { %s1090_s0 = smul.f32 %s1089_s25, %s1086_s16  ;;  %s1099_s2 = sadd.f32 %s1088_s27, %s1080_s19 }
 0x3b0   :  { %s1091_s15 = smul.f32 %s2335_s11, %s1088_s27  ;;  %s2469_s16 = sld [smem:[#allocation7 + $0x6]] }
 0x3b1   :  { %s1093_s20 = smul.f32 %s2335_s11, %s1090_s0  ;;  %s1105_s3 = sadd.f32 %s1090_s0, %s1082_s12 }
 0x3b2   :  { %s1092_s18 = ssub.f32 %s2432_s26, %s1091_s15  ;;  %s1100_s6 = smul.f32 2.0, %s1099_s2 }
 0x3b3   :  { %s1094_s23 = sadd.f32 %s1093_s20, %s2436_s13  ;;  %s1106_s30 = smul.f32 2.0, %s1105_s3 }
 0x3b4   :  { %s1095_s9 = smul.f32 %s1092_s18, %s1466_s14  ;;  %s1101_s7 = sadd.f32 %s1100_s6, %s2441_s24 }
 0x3b5   :  { %s1107_s10 = sadd.f32 %s1106_s30, %s2445_s21 }
 0x3b6   :  { %s1096_s28 = smul.f32 %s1095_s9, %s1094_s23  ;;  %s1097_s1 = ssub.f32 %s1095_s9, %s1472_s17 }
 0x3b8   :  { %s1098_s19 = smul.f32 %s1097_s1, %s1094_s23  ;;  %s1102_s8 = sadd.f32 %s1101_s7, %s1096_s28 }
 0x3b9   :  { %s2502_s7 = sld [smem:[#allocation5 + $0x6]] }
 0x3ba   :  { %s1103_s11 = smul.f32 %s2342_s4, %s1102_s8  ;;  %s1108_s12 = sadd.f32 %s1107_s10, %s1098_s19 }
 0x3bc   :  { %s2473_s29 = ssub.f32 %s2432_s26, %s1103_s11  ;;  %s1109_s24 = smul.f32 %s2342_s4, %s1108_s12 }
 0x3be   :  { %s2477_s21 = sadd.f32 %s1109_s24, %s2436_s13  ;;  %s1122_s27 = smul.f32 %s2473_s29, %s1466_s14 }
 0x3bf   :  { %1112 = sst [smem:[#allocation11 + $0x300]] %s2473_s29 }
 0x3c0   :  { %1114 = sst [smem:[#allocation11 + $0x301]] %s2477_s21  ;;  %s2484_s25 = smul.f32 %s1122_s27, %s2477_s21 }
 0x3c1   :  { %s1115_s26 = ssub.f32 %s1485_s22, %s2473_s29 }
 0x3c2   :  { %s1124_s0 = ssub.f32 %s1122_s27, %s1472_s17  ;;  %s1126_s4 = smul.f32 %s2469_s16, %s2484_s25 }
 0x3c3   :  { %s1116_s13 = ssub.f32 %s1115_s26, %s2477_s21 }
 0x3c4   :  { %s2493_s2 = smul.f32 %s1124_s0, %s2477_s21  ;;  %s1127_s15 = ssub.f32 %s2473_s29, %s1126_s4 }
 0x3c5   :  { %1118 = sst [smem:[#allocation11 + $0x302]] %s1116_s13 }
 0x3c6   :  { %s1128_s20 = smul.f32 %s2469_s16, %s2493_s2  ;;  %s2509_s27 = sld [smem:[#allocation8 + $0x6]] }
 0x3c7   :  { %s1130_s3 = smul.f32 %s1127_s15, %s1466_s14 }
 0x3c8   :  { %s1129_s18 = sadd.f32 %s1128_s20, %s2477_s21 }
 0x3c9   :  { %s1132_s6 = ssub.f32 %s1130_s3, %s1472_s17 }
 0x3ca   :  { %s1131_s23 = smul.f32 %s1130_s3, %s1129_s18 }
 0x3cb   :  { %s1133_s30 = smul.f32 %s1132_s6, %s1129_s18 }
 0x3cc   :  { %s1134_s9 = smul.f32 %s2469_s16, %s1131_s23 }
 0x3cd   :  { %s1136_s10 = smul.f32 %s2469_s16, %s1133_s30 }
 0x3ce   :  { %s1135_s28 = ssub.f32 %s2473_s29, %s1134_s9 }
 0x3cf   :  { %s1137_s1 = sadd.f32 %s1136_s10, %s2477_s21 }
 0x3d0   :  { %s1138_s19 = smul.f32 %s1135_s28, %s1466_s14 }
 0x3d2   :  { %s1139_s8 = smul.f32 %s1138_s19, %s1137_s1  ;;  %s1140_s11 = ssub.f32 %s1138_s19, %s1472_s17 }
 0x3d4   :  { %s1141_s12 = smul.f32 %s1140_s11, %s1137_s1  ;;  %s1150_s24 = sadd.f32 %s1139_s8, %s1131_s23 }
 0x3d5   :  { %s1142_s26 = smul.f32 %s2502_s7, %s1139_s8 }
 0x3d6   :  { %s1144_s0 = smul.f32 %s2502_s7, %s1141_s12  ;;  %s1156_s4 = sadd.f32 %s1141_s12, %s1133_s30 }
 0x3d7   :  { %s1143_s13 = ssub.f32 %s2473_s29, %s1142_s26  ;;  %s1151_s15 = smul.f32 2.0, %s1150_s24 }
 0x3d8   :  { %s1145_s20 = sadd.f32 %s1144_s0, %s2477_s21  ;;  %s1157_s3 = smul.f32 2.0, %s1156_s4 }
 0x3d9   :  { %s1146_s18 = smul.f32 %s1143_s13, %s1466_s14  ;;  %s1152_s6 = sadd.f32 %s1151_s15, %s2484_s25 }
 0x3da   :  { %s1158_s23 = sadd.f32 %s1157_s3, %s2493_s2 }
 0x3db   :  { %s1147_s9 = smul.f32 %s1146_s18, %s1145_s20  ;;  %s1148_s10 = ssub.f32 %s1146_s18, %s1472_s17 }
 0x3dd   :  { %s1149_s28 = smul.f32 %s1148_s10, %s1145_s20  ;;  %s1153_s1 = sadd.f32 %s1152_s6, %s1147_s9 }
 0x3df   :  { %s1154_s19 = smul.f32 %s2509_s27, %s1153_s1  ;;  %s1159_s30 = sadd.f32 %s1158_s23, %s1149_s28 }
 0x3e1   :  { %s2521_s8 = ssub.f32 %s2473_s29, %s1154_s19  ;;  %s1160_s11 = smul.f32 %s2509_s27, %s1159_s30 }
 0x3e3   :  { %s2525_s12 = sadd.f32 %s1160_s11, %s2477_s21  ;;  %s1162_s25 = smul.f32 %s2521_s8, %s1466_s14 }
 0x3e5   :  { %s2530_s2 = smul.f32 %s1162_s25, %s2525_s12  ;;  %s1164_s24 = ssub.f32 %s1162_s25, %s1472_s17 }
 0x3e7   :  { %s2534_s29 = smul.f32 %s1164_s24, %s2525_s12 }
 0x3e8   :  { %s1166_s26 = smul.f32 %s2469_s16, %s2530_s2 }
 0x3e9   :  { %s1168_s0 = smul.f32 %s2469_s16, %s2534_s29 }
 0x3ea   :  { %s1167_s4 = ssub.f32 %s2521_s8, %s1166_s26 }
 0x3eb   :  { %s1169_s21 = sadd.f32 %s1168_s0, %s2525_s12 }
 0x3ec   :  { %s1170_s13 = smul.f32 %s1167_s4, %s1466_s14 }
 0x3ee   :  { %s1171_s15 = smul.f32 %s1170_s13, %s1169_s21  ;;  %s1172_s20 = ssub.f32 %s1170_s13, %s1472_s17 }
 0x3f0   :  { %s1173_s3 = smul.f32 %s1172_s20, %s1169_s21 }
 0x3f1   :  { %s1174_s18 = smul.f32 %s2469_s16, %s1171_s15 }
 0x3f2   :  { %s1176_s6 = smul.f32 %s2469_s16, %s1173_s3 }
 0x3f3   :  { %s1175_s23 = ssub.f32 %s2521_s8, %s1174_s18 }
 0x3f4   :  { %s1177_s9 = sadd.f32 %s1176_s6, %s2525_s12 }
 0x3f5   :  { %s1178_s10 = smul.f32 %s1175_s23, %s1466_s14 }
 0x3f7   :  { %s1179_s28 = smul.f32 %s1178_s10, %s1177_s9  ;;  %s1180_s1 = ssub.f32 %s1178_s10, %s1472_s17 }
 0x3f9   :  { %s1181_s19 = smul.f32 %s1180_s1, %s1177_s9  ;;  %s1190_s30 = sadd.f32 %s1179_s28, %s1171_s15 }
 0x3fa   :  { %s1182_s11 = smul.f32 %s2502_s7, %s1179_s28 }
 0x3fb   :  { %s1184_s25 = smul.f32 %s2502_s7, %s1181_s19  ;;  %s1196_s24 = sadd.f32 %s1181_s19, %s1173_s3 }
 0x3fc   :  { %s1183_s26 = ssub.f32 %s2521_s8, %s1182_s11  ;;  %s1191_s0 = smul.f32 2.0, %s1190_s30 }
 0x3fd   :  { %s1185_s4 = sadd.f32 %s1184_s25, %s2525_s12  ;;  %s1197_s21 = smul.f32 2.0, %s1196_s24 }
 0x3fe   :  { %s1186_s13 = smul.f32 %s1183_s26, %s1466_s14  ;;  %s1192_s20 = sadd.f32 %s1191_s0, %s2530_s2 }
 0x3ff   :  { %s1198_s18 = sadd.f32 %s1197_s21, %s2534_s29 }
 0x400   :  { %s1187_s6 = smul.f32 %s1186_s13, %s1185_s4  ;;  %s1188_s23 = ssub.f32 %s1186_s13, %s1472_s17 }
 0x402   :  { %s1189_s15 = smul.f32 %s1188_s23, %s1185_s4  ;;  %s1193_s9 = sadd.f32 %s1192_s20, %s1187_s6 }
 0x404   :  { %s1194_s10 = smul.f32 %s2509_s27, %s1193_s9  ;;  %s1199_s3 = sadd.f32 %s1198_s18, %s1189_s15 }
 0x406   :  { %s2560_s28 = ssub.f32 %s2521_s8, %s1194_s10  ;;  %s1200_s1 = smul.f32 %s2509_s27, %s1199_s3 }
 0x408   :  { %s2564_s19 = sadd.f32 %s1200_s1, %s2525_s12  ;;  %s1202_s2 = smul.f32 %s2560_s28, %s1466_s14 }
 0x40a   :  { %s2569_s29 = smul.f32 %s1202_s2, %s2564_s19  ;;  %s1204_s30 = ssub.f32 %s1202_s2, %s1472_s17 }
 0x40c   :  { %s2573_s8 = smul.f32 %s1204_s30, %s2564_s19 }
 0x40d   :  { %s1206_s11 = smul.f32 %s2469_s16, %s2569_s29 }
 0x40e   :  { %s1208_s25 = smul.f32 %s2469_s16, %s2573_s8 }
 0x40f   :  { %s1207_s24 = ssub.f32 %s2560_s28, %s1206_s11 }
 0x410   :  { %s1209_s12 = sadd.f32 %s1208_s25, %s2564_s19 }
 0x411   :  { %s1210_s26 = smul.f32 %s1207_s24, %s1466_s14 }
 0x413   :  { %s1211_s0 = smul.f32 %s1210_s26, %s1209_s12  ;;  %s1212_s4 = ssub.f32 %s1210_s26, %s1472_s17 }
 0x415   :  { %s1213_s21 = smul.f32 %s1212_s4, %s1209_s12 }
 0x416   :  { %s1214_s13 = smul.f32 %s2469_s16, %s1211_s0 }
 0x417   :  { %s1216_s20 = smul.f32 %s2469_s16, %s1213_s21 }
 0x418   :  { %s1215_s18 = ssub.f32 %s2560_s28, %s1214_s13 }
 0x419   :  { %s1217_s6 = sadd.f32 %s1216_s20, %s2564_s19 }
 0x41a   :  { %s1218_s23 = smul.f32 %s1215_s18, %s1466_s14 }
 0x41c   :  { %s1219_s15 = smul.f32 %s1218_s23, %s1217_s6  ;;  %s1220_s9 = ssub.f32 %s1218_s23, %s1472_s17 }
 0x41e   :  { %s1221_s10 = smul.f32 %s1220_s9, %s1217_s6  ;;  %s1230_s3 = sadd.f32 %s1219_s15, %s1211_s0 }
 0x41f   :  { %s1222_s1 = smul.f32 %s2502_s7, %s1219_s15 }
 0x420   :  { %s1224_s2 = smul.f32 %s2502_s7, %s1221_s10  ;;  %s1236_s30 = sadd.f32 %s1221_s10, %s1213_s21 }
 0x421   :  { %s1223_s11 = ssub.f32 %s2560_s28, %s1222_s1  ;;  %s1231_s25 = smul.f32 2.0, %s1230_s3 }
 0x422   :  { %s1225_s24 = sadd.f32 %s1224_s2, %s2564_s19  ;;  %s1237_s12 = smul.f32 2.0, %s1236_s30 }
 0x423   :  { %s1226_s26 = smul.f32 %s1223_s11, %s1466_s14  ;;  %s1232_s4 = sadd.f32 %s1231_s25, %s2569_s29 }
 0x424   :  { %s1238_s13 = sadd.f32 %s1237_s12, %s2573_s8 }
 0x425   :  { %s1227_s20 = smul.f32 %s1226_s26, %s1225_s24  ;;  %s1228_s18 = ssub.f32 %s1226_s26, %s1472_s17 }
 0x427   :  { %s1229_s0 = smul.f32 %s1228_s18, %s1225_s24  ;;  %s1233_s6 = sadd.f32 %s1232_s4, %s1227_s20 }
 0x429   :  { %s1234_s23 = smul.f32 %s2509_s27, %s1233_s6  ;;  %s1239_s21 = sadd.f32 %s1238_s13, %s1229_s0 }
 0x42b   :  { %s2599_s15 = ssub.f32 %s2560_s28, %s1234_s23  ;;  %s1240_s9 = smul.f32 %s2509_s27, %s1239_s21 }
 0x42d   :  { %s2603_s10 = sadd.f32 %s1240_s9, %s2564_s19  ;;  %s1242_s29 = smul.f32 %s2599_s15, %s1466_s14 }
 0x42f   :  { %s2608_s8 = smul.f32 %s1242_s29, %s2603_s10  ;;  %s1244_s3 = ssub.f32 %s1242_s29, %s1472_s17 }
 0x431   :  { %s2612_s28 = smul.f32 %s1244_s3, %s2603_s10 }
 0x432   :  { %s1246_s1 = smul.f32 %s2469_s16, %s2608_s8 }
 0x433   :  { %s1248_s2 = smul.f32 %s2469_s16, %s2612_s28 }
 0x434   :  { %s1247_s30 = ssub.f32 %s2599_s15, %s1246_s1 }
 0x435   :  { %s1249_s19 = sadd.f32 %s1248_s2, %s2603_s10 }
 0x436   :  { %s1250_s11 = smul.f32 %s1247_s30, %s1466_s14 }
 0x438   :  { %s1251_s25 = smul.f32 %s1250_s11, %s1249_s19  ;;  %s1252_s24 = ssub.f32 %s1250_s11, %s1472_s17 }
 0x43a   :  { %s1253_s12 = smul.f32 %s1252_s24, %s1249_s19 }
 0x43b   :  { %s1254_s26 = smul.f32 %s2469_s16, %s1251_s25 }
 0x43c   :  { %s1256_s4 = smul.f32 %s2469_s16, %s1253_s12 }
 0x43d   :  { %s1255_s13 = ssub.f32 %s2599_s15, %s1254_s26 }
 0x43e   :  { %s1257_s20 = sadd.f32 %s1256_s4, %s2603_s10 }
 0x43f   :  { %s1258_s18 = smul.f32 %s1255_s13, %s1466_s14 }
 0x441   :  { %s1259_s0 = smul.f32 %s1258_s18, %s1257_s20  ;;  %s1260_s6 = ssub.f32 %s1258_s18, %s1472_s17 }
 0x443   :  { %s1261_s23 = smul.f32 %s1260_s6, %s1257_s20  ;;  %s1270_s21 = sadd.f32 %s1259_s0, %s1251_s25 }
 0x444   :  { %s1262_s9 = smul.f32 %s2502_s7, %s1259_s0 }
 0x445   :  { %s1264_s29 = smul.f32 %s2502_s7, %s1261_s23  ;;  %s1276_s3 = sadd.f32 %s1261_s23, %s1253_s12 }
 0x446   :  { %s1263_s1 = ssub.f32 %s2599_s15, %s1262_s9  ;;  %s1271_s2 = smul.f32 2.0, %s1270_s21 }
 0x447   :  { %s1265_s16 = sadd.f32 %s1264_s29, %s2603_s10  ;;  %s1277_s30 = smul.f32 2.0, %s1276_s3 }
 0x448   :  { %s1266_s19 = smul.f32 %s1263_s1, %s1466_s14  ;;  %s1272_s11 = sadd.f32 %s1271_s2, %s2608_s8 }
 0x449   :  { %s1278_s24 = sadd.f32 %s1277_s30, %s2612_s28  ;;  %s1296_s21 = sshll.u32 %s2649_s5, 4  ;;  %s1297_s21 = int_to_ptr.vmem [resolvable:$true] %s1296_s21 }
 0x44a   :  { %s1267_s26 = smul.f32 %s1266_s19, %s1265_s16  ;;  %s1268_s4 = ssub.f32 %s1266_s19, %s1472_s17 }
 0x44b   :  { %s1395_s8 = scalar_lea.vmem %s1297_s21, 128  ;;  %p1400_p12 = scmp.lt.s32.totalorder %s1297_s21, %s1297_s21 }
 0x44c   :  { %s1269_s13 = smul.f32 %s1268_s4, %s1265_s16  ;;  %s1273_s20 = sadd.f32 %s1272_s11, %s1267_s26 }
 0x44d   :  { %p1396_p11 = scmp.ne.s32.totalorder %s1297_s21, %s1395_s8  ;;  %p1401_p13 = scmp.lt.s32.totalorder %s1395_s8, %s1395_s8 }
 0x44e   :  { %s1274_s18 = smul.f32 %s2509_s27, %s1273_s20  ;;  %s1279_s25 = sadd.f32 %s1278_s24, %s1269_s13 }
 0x44f   :  { %p1402_p0 = por %p1401_p13, %p1400_p12 }
 0x450   :  { %s1280_s0 = smul.f32 %s2509_s27, %s1279_s25  ;;  %s1275_s6 = ssub.f32 %s2599_s15, %s1274_s18 }
 0x451   :  { %p1403_p1 = pnand %p1402_p0, %p1396_p11 }
 0x452   :  { %s1281_s7 = sadd.f32 %s1280_s0, %s2603_s10 }
 0x453   :  { %1283 = sst [smem:[#allocation11 + $0x380]] %s1275_s6 }
 0x454   :  { %1285 = sst [smem:[#allocation11 + $0x381]] %s1281_s7 }
 0x455   :  { %s1286_s9 = ssub.f32 %s1485_s22, %s1275_s6 }
 0x457   :  { %s1287_s14 = ssub.f32 %s1286_s9, %s1281_s7 }
 0x459   :  { %1289 = sst [smem:[#allocation11 + $0x382]] %s1287_s14 }
 0x45a   :  { %1406 = shalt.err (!%p1403_p1)
}
 0x45b   :  { %s1420_s17 = smov [#allocation11]  }
 0x45c   :  { %1299 = dma.smem_to_vmem %s1420_s17, 128, %s1297_s21, [#allocation4]  }
 0x45d   :  { %1413 = dma.done.wait [#allocation4], 128  }
 0x45e   :  { %1414 = vsyncadd [#allocation4], 4294967168 }
 0x45f   :  { %1303 = sfence }
 0x460   :  { %1304 = vsyncpa [#allocation3], 1 }
 0x461   :  { %1305 = vsyncpa [#allocation6], 1 }
 0x462   :  { %1306 = vsyncpa [#allocation9], 1 }
 0x463   :  { %1307 = vsyncpa [#allocation4], 1 }

</bundles_post_ra>
